<compile_context>
chip_gen: v5e
topology: v5e:2x2
jax: 0.10.0
libtpu: 0.0.40
codegen_flags: <defaults>
</compile_context>

<pallas_src>
import functools

import numpy as np
import jax
import jax.numpy as jnp
from jax import lax
from jax.experimental import pallas as pl
from jax.experimental.pallas import tpu as pltpu

IN_CH = 3          # input channels of the stem conv
L_IN = 64          # input sequence length
WIDTH = 64         # widthi[0]
NUM_CLASSES = 3    # n_output_neurons
STEM_K = 7         # stem kernel size
SEQ_ROWS = 8       # time positions per sequence row after phase packing
OUT_LANES = 128    # lane-dense logits block width (classes padded to 128)

# Batch tile.  32 rows/sample-tile = 256 matmul rows per grid step (good for
# v5e/v6e); on v6e/v7x with large batches this can be raised toward 64-128.
TB_MAX = 32

# ---- per-tap 64x64 weight indices in the (13, 64, 64) tap slab ----
_T_B1C1_L, _T_B1C1_C, _T_B1C1_R, _T_B1_SC = 0, 1, 2, 3
_T_B1C2_L, _T_B1C2_C, _T_B1C2_R = 4, 5, 6
_T_B2C1_L, _T_B2C1_C, _T_B2C1_R = 7, 8, 9
_T_B2C2_L, _T_B2C2_C, _T_B2C2_R = 10, 11, 12
N_TAPS = 13

# ---- packed scale/shift/bias slab row indices (vec is (16, 128) f32) ----
_V_STEM_SHIFT = 0   # width 64 (bn1 shift; bn1 scale folded into stem weights)
_V_B1A_SCALE = 1
_V_B1A_SHIFT = 2
_V_B1B_SCALE = 3
_V_B1B_SHIFT = 4
_V_B2A_SCALE = 5
_V_B2A_SHIFT = 6
_V_B2B_SCALE = 7
_V_B2B_SHIFT = 8
_V_CLS_BIAS = 9     # width 128 (classes in lanes 0:3)
VEC_ROWS = 16


def _resnetv2_kernel(xin_ref, wstem_ref, wtap_ref, wcls_ref, wpool_ref, vec_ref,
                     out_ref, *, tb, prev_shift, next_shift):
    """Fused ResNetv2 forward for one batch tile.

    xin_ref:   (tb*8, 48)  bf16  stem input, im2col'd over the 2 coarse taps
    wstem_ref: (4, 48, 64) bf16  stem weights, one (48,64) block per packed phase
    wtap_ref:  (13, 64, 64) bf16 per-tap conv weights (+ 1x1 shortcut)
    wcls_ref:  (64, 128)   bf16  classifier weights padded to 128 lanes
    wpool_ref: (tb, tb*8)  bf16  constant block-averaging (GAP) matrix
    vec_ref:   (16, 128)   f32   per-channel scales / shifts / bias
    out_ref:   (tb, 128)   f32   logits (lanes 0:3 meaningful)
    """
    f32, bf16 = jnp.float32, jnp.bfloat16
    W, L = WIDTH, SEQ_ROWS
    R = tb * L

    def mm(a, b):  # bf16 MXU matmul, f32 accumulation
        return jnp.dot(a.astype(bf16), b, preferred_element_type=f32)

    # boundary masks (position of each flat row inside its length-8 sequence),
    # computed once and reused by every shift call site.
    rix = lax.broadcasted_iota(jnp.int32, (R, 1), 0) % L
    first_row = rix == 0
    last_row = rix == L - 1

    def shift_prev(x):  # y[j] = x[j-1] within each sequence, zero at j == 0
        return jnp.where(first_row, 0.0, pltpu.roll(x, prev_shift, axis=0))

    def shift_next(x):  # y[j] = x[j+1] within each sequence, zero at j == L-1
        return jnp.where(last_row, 0.0, pltpu.roll(x, next_shift, axis=0))

    def vrow(i, width=WIDTH):
        return vec_ref[i:i + 1, 0:width]

    # ---- stem Conv1d(3->64, k=7, s=2, p=3) + BN1 + ReLU --------------------
    # One matmul per packed output phase q: row j, phase q = stem output 4j+q.
    xin = xin_ref[...]
    stem_shift = vrow(_V_STEM_SHIFT)
    ph = [jnp.maximum(mm(xin, wstem_ref[q]) + stem_shift, 0.0) for q in range(4)]

    # ---- MaxPool1d(k=3, s=2, p=1) ------------------------------------------
    # Input is post-ReLU (>= 0), so zero padding is equivalent to -inf padding.
    m_even = jnp.maximum(jnp.maximum(shift_prev(ph[3]), ph[0]), ph[1])  # pool[2j]
    m_odd = jnp.maximum(jnp.maximum(ph[1], ph[2]), ph[3])               # pool[2j+1]

    # ---- block 1: pre-activation, stride 2, 1x1 projection shortcut --------
    sa, ta = vrow(_V_B1A_SCALE), vrow(_V_B1A_SHIFT)
    p_even = jnp.maximum(m_even * sa + ta, 0.0)
    p_odd = jnp.maximum(m_odd * sa + ta, 0.0)
    out1 = (mm(shift_prev(p_odd), wtap_ref[_T_B1C1_L])
            + mm(p_even, wtap_ref[_T_B1C1_C])
            + mm(p_odd, wtap_ref[_T_B1C1_R]))
    sc = mm(p_even, wtap_ref[_T_B1_SC])          # 1x1 stride-2 shortcut
    u = jnp.maximum(out1 * vrow(_V_B1B_SCALE) + vrow(_V_B1B_SHIFT), 0.0)
    # dropout(p=0.05) is the identity at inference time
    y1 = (mm(shift_prev(u), wtap_ref[_T_B1C2_L])
          + mm(u, wtap_ref[_T_B1C2_C])
          + mm(shift_next(u), wtap_ref[_T_B1C2_R]) + sc)

    # ---- block 2: pre-activation, stride 1, identity shortcut --------------
    p = jnp.maximum(y1 * vrow(_V_B2A_SCALE) + vrow(_V_B2A_SHIFT), 0.0)
    o1 = (mm(shift_prev(p), wtap_ref[_T_B2C1_L])
          + mm(p, wtap_ref[_T_B2C1_C])
          + mm(shift_next(p), wtap_ref[_T_B2C1_R]))
    u2 = jnp.maximum(o1 * vrow(_V_B2B_SCALE) + vrow(_V_B2B_SHIFT), 0.0)
    y2 = y1 + (mm(shift_prev(u2), wtap_ref[_T_B2C2_L])
               + mm(u2, wtap_ref[_T_B2C2_C])
               + mm(shift_next(u2), wtap_ref[_T_B2C2_R]))

    # ---- AdaptiveAvgPool1d(1) via baked (tb, tb*8) averaging matrix --------
    emb = jnp.dot(wpool_ref[...], y2.astype(bf16), preferred_element_type=f32)

    # ---- classifier Linear(64 -> 3), lane-dense (tb, 128) output -----------
    out_ref[...] = mm(emb, wcls_ref[...]) + vrow(_V_CLS_BIAS, OUT_LANES)


# ============================ parameter handling ============================

def init_params(key):
    """Deterministic parameters with PyTorch-convention shapes (eval mode)."""
    W, C = WIDTH, NUM_CLASSES
    kit = iter(jax.random.split(key, 32))

    def nrm(shape, s=0.1):
        return s * jax.random.normal(next(kit), shape, jnp.float32)

    def bn(c):
        return {"g": 1.0 + nrm((c,)), "b": nrm((c,)),
                "m": nrm((c,)), "v": 1.0 + jnp.abs(nrm((c,)))}

    return {
        "stem_w": nrm((W, IN_CH, STEM_K)),          # Conv1d(3, 64, 7) weight
        "bn1": bn(W),
        "block1": {"bn_a": bn(W), "conv1_w": nrm((W, W, 3)), "bn_b": bn(W),
                   "conv2_w": nrm((W, W, 3)), "down_w": nrm((W, W, 1))},
        "block2": {"bn_a": bn(W), "conv1_w": nrm((W, W, 3)), "bn_b": bn(W),
                   "conv2_w": nrm((W, W, 3))},
        "cls_w": nrm((C, W)),                       # Linear(64, 3) weight
        "cls_b": nrm((C,)),
    }


def _fold_bn(bn, eps=1e-5):
    s = np.asarray(bn["g"]) / np.sqrt(np.asarray(bn["v"]) + eps)
    t = np.asarray(bn["b"]) - np.asarray(bn["m"]) * s
    return s.astype(np.float32), t.astype(np.float32)


def prepare_params(params):
    """One-time packing of all weights into small bf16 slabs (done at init,
    NOT inside the per-call forward)."""
    W = WIDTH

    # --- stem: fold bn1 scale into the conv weight; one (48, 64) block per
    # packed output phase q (columns are [coarse tap a | in-row phase r | cin]).
    s1, t1 = _fold_bn(params["bn1"])
    ws = np.transpose(np.asarray(params["stem_w"]), (2, 1, 0)) * s1[None, None, :]  # (7,3,64)
    wstem = np.zeros((4, 2 * 8 * IN_CH, W), np.float32)
    for q in range(4):
        for a in range(2):
            for r in range(8):
                k = 8 * a + r - 2 * q
                if 0 <= k < STEM_K:
                    c = 24 * a + 3 * r
                    wstem[q, c:c + 3, :] = ws[k]

    def conv_taps(w):  # PyTorch (Cout, Cin, K) -> (K, Cin, Cout)
        return np.transpose(np.asarray(w), (2, 1, 0))

    b1, b2 = params["block1"], params["block2"]
    sa, ta = _fold_bn(b1["bn_a"])
    sb, tb_ = _fold_bn(b1["bn_b"])
    sc_, tc = _fold_bn(b2["bn_a"])
    sd, td = _fold_bn(b2["bn_b"])
    w1 = conv_taps(b1["conv1_w"])
    w2 = conv_taps(b1["conv2_w"])
    w3 = conv_taps(b2["conv1_w"])
    w4 = conv_taps(b2["conv2_w"])
    wsc = np.asarray(b1["down_w"])[:, :, 0].T                            # (Cin, Cout)

    taps = np.zeros((N_TAPS, W, W), np.float32)
    taps[_T_B1C1_L], taps[_T_B1C1_C], taps[_T_B1C1_R] = w1[0], w1[1], w1[2]
    taps[_T_B1_SC] = wsc
    taps[_T_B1C2_L], taps[_T_B1C2_C], taps[_T_B1C2_R] = w2[0], w2[1], w2[2]
    taps[_T_B2C1_L], taps[_T_B2C1_C], taps[_T_B2C1_R] = w3[0], w3[1], w3[2]
    taps[_T_B2C2_L], taps[_T_B2C2_C], taps[_T_B2C2_R] = w4[0], w4[1], w4[2]

    wcls = np.zeros((W, OUT_LANES), np.float32)                          # lane-dense
    wcls[:, :NUM_CLASSES] = np.asarray(params["cls_w"]).T

    vec = np.zeros((VEC_ROWS, OUT_LANES), np.float32)
    vec[_V_STEM_SHIFT, :W] = t1
    vec[_V_B1A_SCALE, :W] = sa
    vec[_V_B1A_SHIFT, :W] = ta
    vec[_V_B1B_SCALE, :W] = sb
    vec[_V_B1B_SHIFT, :W] = tb_
    vec[_V_B2A_SCALE, :W] = sc_
    vec[_V_B2A_SHIFT, :W] = tc
    vec[_V_B2B_SCALE, :W] = sd
    vec[_V_B2B_SHIFT, :W] = td
    vec[_V_CLS_BIAS, :NUM_CLASSES] = np.asarray(params["cls_b"])

    return {"stem": jnp.asarray(wstem, jnp.bfloat16),
            "tap": jnp.asarray(taps, jnp.bfloat16),
            "cls": jnp.asarray(wcls, jnp.bfloat16),
            "vec": jnp.asarray(vec, jnp.float32)}


# ================================ forward ===================================

def _pick_tb(batch):
    if batch >= TB_MAX:
        return TB_MAX
    return max(8, ((batch + 7) // 8) * 8)


@functools.lru_cache(maxsize=None)
def _probe_roll_is_jnp_like():
    """One-off probe kernel: does pltpu.roll(x, +1, axis=0) behave like
    jnp.roll (result[j] = x[j-1])?  Pins the shift direction used below."""
    def probe(o_ref):
        o_ref[...] = pltpu.roll(
            lax.broadcasted_iota(jnp.float32, (8, 128), 0), 1, axis=0)
    try:
        out = pl.pallas_call(
            probe, out_shape=jax.ShapeDtypeStruct((8, 128), jnp.float32))()
        return bool(np.asarray(jax.device_get(out))[1, 0] == 0.0)
    except Exception:   # fall back to the documented jnp.roll-like semantics
        return True


@functools.partial(jax.jit, static_argnames=("roll_like_jnp",))
def _forward_impl(x, wstem, wtap, wcls, vec, *, roll_like_jnp):
    B = x.shape[0]
    tb = _pick_tb(B)
    Bp = ((B + tb - 1) // tb) * tb
    R = tb * SEQ_ROWS

    # --- input prep (the only per-call wrapper work): NCL -> NLC, stem conv
    # padding (3 front / 5 back -> 72 rows), pack 8 positions per row and
    # im2col the two coarse stem taps -> (Bp*8, 48) in bf16. ---
    xt = jnp.transpose(x, (0, 2, 1)).astype(jnp.float32)                 # (B, 64, 3)
    xt = jnp.pad(xt, ((0, Bp - B), (3, 5), (0, 0)))                      # (Bp, 72, 3)
    x8 = xt.reshape(Bp, 9, 8 * IN_CH)                                    # (Bp, 9, 24)
    xin = jnp.concatenate([x8[:, 0:8, :], x8[:, 1:9, :]], axis=-1)       # (Bp, 8, 48)
    xin = xin.reshape(Bp * SEQ_ROWS, 2 * 8 * IN_CH).astype(jnp.bfloat16)

    # Constant (tb, tb*8) averaging matrix for the GAP (trace-time constant;
    # stays VMEM-resident across grid steps -> no O(B^2) in-kernel pool).
    pool = np.kron(np.eye(tb, dtype=np.float32),
                   np.full((1, SEQ_ROWS), 1.0 / SEQ_ROWS, np.float32))
    wpool = jnp.asarray(pool, jnp.bfloat16)

    prev_shift = 1 if roll_like_jnp else R - 1
    next_shift = R - 1 if roll_like_jnp else 1

    kernel = functools.partial(_resnetv2_kernel, tb=tb,
                               prev_shift=prev_shift, next_shift=next_shift)

    grid = (Bp // tb,)
    flops = int(grid[0] * (2 * R * 48 * WIDTH * 4          # stem (4 phases)
                           + 2 * R * WIDTH * WIDTH * N_TAPS  # conv taps
                           + 2 * tb * R * WIDTH              # GAP
                           + 2 * tb * WIDTH * OUT_LANES))    # classifier
    bytes_accessed = int(xin.size * 2 + Bp * OUT_LANES * 4
                         + (wstem.size + wtap.size + wcls.size + wpool.size) * 2
                         + vec.size * 4)

    out = pl.pallas_call(
        kernel,
        out_shape=jax.ShapeDtypeStruct((Bp, OUT_LANES), jnp.float32),
        grid_spec=pltpu.PrefetchScalarGridSpec(
            num_scalar_prefetch=0,
            grid=grid,
            in_specs=[
                pl.BlockSpec((R, 2 * 8 * IN_CH), lambda i: (i, 0)),       # xin
                pl.BlockSpec((4, 48, WIDTH), lambda i: (0, 0, 0)),        # stem
                pl.BlockSpec((N_TAPS, WIDTH, WIDTH), lambda i: (0, 0, 0)),  # taps
                pl.BlockSpec((WIDTH, OUT_LANES), lambda i: (0, 0)),       # classifier
                pl.BlockSpec((tb, R), lambda i: (0, 0)),                  # GAP matrix
                pl.BlockSpec((VEC_ROWS, OUT_LANES), lambda i: (0, 0)),    # vec
            ],
            out_specs=pl.BlockSpec((tb, OUT_LANES), lambda i: (i, 0)),
        ),
        compiler_params=pltpu.CompilerParams(dimension_semantics=("parallel",)),
        cost_estimate=pl.CostEstimate(flops=flops, transcendentals=0,
                                      bytes_accessed=bytes_accessed),
    )(xin, wstem, wtap, wcls, wpool, vec)

    return out[:B, :NUM_CLASSES]


def resnet_forward(x, prepared):
    """x: (B, 3, 64) float32 -> logits (B, 3)."""
    assert x.shape[1:] == (IN_CH, L_IN)
    return _forward_impl(x, prepared["stem"], prepared["tap"], prepared["cls"],
                         prepared["vec"], roll_like_jnp=_probe_roll_is_jnp_like())


if __name__ == "__main__":
    key = jax.random.PRNGKey(0)
    k_x, k_p = jax.random.split(key)

    params = init_params(k_p)
    prepared = prepare_params(params)     # one-time weight packing (hoisted out of the forward)

    # (batch=2, channels=3, length=64) input for the 1-D ResNet
    x = jax.random.normal(k_x, (2, IN_CH, L_IN), jnp.float32)

    logits = resnet_forward(x, prepared)
    jax.block_until_ready(logits)
    assert logits.shape == (2, NUM_CLASSES) and logits.dtype == jnp.float32
    print("KERNEL_OK")
</pallas_src>

<mosaic_0001>
module attributes {stable_mosaic.version = 11 : i64} {
  func.func @_resnetv2_kernel(%arg0: i32, %arg1: memref<64x48xbf16, #tpu.memory_space<vmem>>, %arg2: memref<4x48x64xbf16, #tpu.memory_space<vmem>>, %arg3: memref<13x64x64xbf16, #tpu.memory_space<vmem>>, %arg4: memref<64x128xbf16, #tpu.memory_space<vmem>>, %arg5: memref<8x64xbf16, #tpu.memory_space<vmem>>, %arg6: memref<16x128xf32, #tpu.memory_space<vmem>>, %arg7: memref<8x128xf32, #tpu.memory_space<vmem>>) attributes {dimension_semantics = [#tpu.dimension_semantics<parallel>], iteration_bounds = array<i64: 1>, scalar_prefetch = 0 : i64, scratch_operands = 0 : i64, tpu.core_type = #tpu.core_type<tc>, window_params = [{transform_indices = @transform_0, window_bounds = array<i64: 64, 48>}, {pipeline_mode = #tpu.pipeline_mode<synchronous>, transform_indices = @transform_1, window_bounds = array<i64: 4, 48, 64>}, {pipeline_mode = #tpu.pipeline_mode<synchronous>, transform_indices = @transform_2, window_bounds = array<i64: 13, 64, 64>}, {pipeline_mode = #tpu.pipeline_mode<synchronous>, transform_indices = @transform_3, window_bounds = array<i64: 64, 128>}, {pipeline_mode = #tpu.pipeline_mode<synchronous>, transform_indices = @transform_4, window_bounds = array<i64: 8, 64>}, {pipeline_mode = #tpu.pipeline_mode<synchronous>, transform_indices = @transform_5, window_bounds = array<i64: 16, 128>}, {transform_indices = @transform_6, window_bounds = array<i64: 8, 128>}]} {
    %0 = tpu.iota {dimensions = array<i32: 0>} : vector<64x1xi32>
    %c8_i32 = arith.constant 8 : i32
    %c0_i32 = arith.constant 0 : i32
    %1 = arith.cmpi eq, %c8_i32, %c0_i32 : i32
    %c1_i32 = arith.constant 1 : i32
    %2 = arith.select %1, %c1_i32, %c8_i32 : i32
    %3 = vector.broadcast %2 : i32 to vector<64x1xi32>
    %4 = arith.remsi %0, %3 : vector<64x1xi32>
    %c0_i32_0 = arith.constant 0 : i32
    %5 = vector.broadcast %c0_i32_0 : i32 to vector<64x1xi32>
    %6 = arith.cmpi ne, %4, %5 : vector<64x1xi32>
    %c0_i32_1 = arith.constant 0 : i32
    %7 = vector.broadcast %c0_i32_1 : i32 to vector<64x1xi32>
    %8 = arith.cmpi slt, %4, %7 : vector<64x1xi32>
    %c0_i32_2 = arith.constant 0 : i32
    %9 = arith.cmpi slt, %2, %c0_i32_2 : i32
    %10 = vector.broadcast %9 : i1 to vector<64x1xi1>
    %11 = vector.broadcast %10 : vector<64x1xi1> to vector<64x1xi1>
    %12 = arith.xori %8, %11 : vector<64x1xi1>
    %13 = arith.andi %12, %6 : vector<64x1xi1>
    %14 = vector.broadcast %2 : i32 to vector<64x1xi32>
    %15 = arith.addi %4, %14 : vector<64x1xi32>
    %16 = arith.select %13, %15, %4 : vector<64x1xi1>, vector<64x1xi32>
    %c0_i32_3 = arith.constant 0 : i32
    %17 = vector.broadcast %c0_i32_3 : i32 to vector<64x1xi32>
    %18 = arith.cmpi eq, %16, %17 : vector<64x1xi32>
    %c7_i32 = arith.constant 7 : i32
    %19 = vector.broadcast %c7_i32 : i32 to vector<64x1xi32>
    %20 = arith.cmpi eq, %16, %19 : vector<64x1xi32>
    %c0 = arith.constant 0 : index
    %c0_4 = arith.constant 0 : index
    %21 = vector.load %arg1[%c0, %c0_4] : memref<64x48xbf16, #tpu.memory_space<vmem>>, vector<64x48xbf16>
    %c0_5 = arith.constant 0 : index
    %c0_6 = arith.constant 0 : index
    %22 = vector.load %arg6[%c0_5, %c0_6] : memref<16x128xf32, #tpu.memory_space<vmem>>, vector<1x64xf32>
    %c0_7 = arith.constant 0 : index
    %c0_8 = arith.constant 0 : index
    %c0_9 = arith.constant 0 : index
    %23 = vector.load %arg2[%c0_7, %c0_8, %c0_9] : memref<4x48x64xbf16, #tpu.memory_space<vmem>>, vector<1x48x64xbf16>
    %24 = vector.shape_cast %23 : vector<1x48x64xbf16> to vector<48x64xbf16>
    %cst = arith.constant dense<0.000000e+00> : vector<64x64xf32>
    %25 = tpu.matmul %21, %24, %cst {dimension_numbers = #tpu.dot_dimension_numbers<[1], [0], [0], [1], [0, 0, 1, 1], [], []>} : vector<64x48xbf16>, vector<48x64xbf16>, vector<64x64xf32> -> vector<64x64xf32>
    %26 = vector.broadcast %22 : vector<1x64xf32> to vector<64x64xf32>
    %27 = arith.addf %25, %26 : vector<64x64xf32>
    %cst_10 = arith.constant 0.000000e+00 : f32
    %28 = vector.broadcast %cst_10 : f32 to vector<64x64xf32>
    %29 = arith.maximumf %27, %28 : vector<64x64xf32>
    %c1 = arith.constant 1 : index
    %c0_11 = arith.constant 0 : index
    %c0_12 = arith.constant 0 : index
    %30 = vector.load %arg2[%c1, %c0_11, %c0_12] : memref<4x48x64xbf16, #tpu.memory_space<vmem>>, vector<1x48x64xbf16>
    %31 = vector.shape_cast %30 : vector<1x48x64xbf16> to vector<48x64xbf16>
    %cst_13 = arith.constant dense<0.000000e+00> : vector<64x64xf32>
    %32 = tpu.matmul %21, %31, %cst_13 {dimension_numbers = #tpu.dot_dimension_numbers<[1], [0], [0], [1], [0, 0, 1, 1], [], []>} : vector<64x48xbf16>, vector<48x64xbf16>, vector<64x64xf32> -> vector<64x64xf32>
    %33 = vector.broadcast %22 : vector<1x64xf32> to vector<64x64xf32>
    %34 = arith.addf %32, %33 : vector<64x64xf32>
    %cst_14 = arith.constant 0.000000e+00 : f32
    %35 = vector.broadcast %cst_14 : f32 to vector<64x64xf32>
    %36 = arith.maximumf %34, %35 : vector<64x64xf32>
    %c2 = arith.constant 2 : index
    %c0_15 = arith.constant 0 : index
    %c0_16 = arith.constant 0 : index
    %37 = vector.load %arg2[%c2, %c0_15, %c0_16] : memref<4x48x64xbf16, #tpu.memory_space<vmem>>, vector<1x48x64xbf16>
    %38 = vector.shape_cast %37 : vector<1x48x64xbf16> to vector<48x64xbf16>
    %cst_17 = arith.constant dense<0.000000e+00> : vector<64x64xf32>
    %39 = tpu.matmul %21, %38, %cst_17 {dimension_numbers = #tpu.dot_dimension_numbers<[1], [0], [0], [1], [0, 0, 1, 1], [], []>} : vector<64x48xbf16>, vector<48x64xbf16>, vector<64x64xf32> -> vector<64x64xf32>
    %40 = vector.broadcast %22 : vector<1x64xf32> to vector<64x64xf32>
    %41 = arith.addf %39, %40 : vector<64x64xf32>
    %cst_18 = arith.constant 0.000000e+00 : f32
    %42 = vector.broadcast %cst_18 : f32 to vector<64x64xf32>
    %43 = arith.maximumf %41, %42 : vector<64x64xf32>
    %c3 = arith.constant 3 : index
    %c0_19 = arith.constant 0 : index
    %c0_20 = arith.constant 0 : index
    %44 = vector.load %arg2[%c3, %c0_19, %c0_20] : memref<4x48x64xbf16, #tpu.memory_space<vmem>>, vector<1x48x64xbf16>
    %45 = vector.shape_cast %44 : vector<1x48x64xbf16> to vector<48x64xbf16>
    %cst_21 = arith.constant dense<0.000000e+00> : vector<64x64xf32>
    %46 = tpu.matmul %21, %45, %cst_21 {dimension_numbers = #tpu.dot_dimension_numbers<[1], [0], [0], [1], [0, 0, 1, 1], [], []>} : vector<64x48xbf16>, vector<48x64xbf16>, vector<64x64xf32> -> vector<64x64xf32>
    %47 = vector.broadcast %22 : vector<1x64xf32> to vector<64x64xf32>
    %48 = arith.addf %46, %47 : vector<64x64xf32>
    %cst_22 = arith.constant 0.000000e+00 : f32
    %49 = vector.broadcast %cst_22 : f32 to vector<64x64xf32>
    %50 = arith.maximumf %48, %49 : vector<64x64xf32>
    %c1_i32_23 = arith.constant 1 : i32
    %51 = tpu.dynamic_rotate %50 by %c1_i32_23 dim 0 : vector<64x64xf32>, i32 -> vector<64x64xf32>
    %cst_24 = arith.constant 0.000000e+00 : f32
    %52 = vector.shape_cast %18 : vector<64x1xi1> to vector<64x1xi1>
    %53 = vector.broadcast %52 : vector<64x1xi1> to vector<64x64xi1>
    %54 = vector.broadcast %cst_24 : f32 to vector<64x64xf32>
    %55 = arith.select %53, %54, %51 : vector<64x64xi1>, vector<64x64xf32>
    %56 = arith.maximumf %55, %29 : vector<64x64xf32>
    %57 = arith.maximumf %56, %36 : vector<64x64xf32>
    %58 = arith.maximumf %36, %43 : vector<64x64xf32>
    %59 = arith.maximumf %58, %50 : vector<64x64xf32>
    %c1_25 = arith.constant 1 : index
    %c0_26 = arith.constant 0 : index
    %60 = vector.load %arg6[%c1_25, %c0_26] : memref<16x128xf32, #tpu.memory_space<vmem>>, vector<1x64xf32>
    %c2_27 = arith.constant 2 : index
    %c0_28 = arith.constant 0 : index
    %61 = vector.load %arg6[%c2_27, %c0_28] : memref<16x128xf32, #tpu.memory_space<vmem>>, vector<1x64xf32>
    %62 = vector.broadcast %60 : vector<1x64xf32> to vector<64x64xf32>
    %63 = arith.mulf %57, %62 : vector<64x64xf32>
    %64 = vector.broadcast %61 : vector<1x64xf32> to vector<64x64xf32>
    %65 = arith.addf %63, %64 : vector<64x64xf32>
    %cst_29 = arith.constant 0.000000e+00 : f32
    %66 = vector.broadcast %cst_29 : f32 to vector<64x64xf32>
    %67 = arith.maximumf %65, %66 : vector<64x64xf32>
    %68 = vector.broadcast %60 : vector<1x64xf32> to vector<64x64xf32>
    %69 = arith.mulf %59, %68 : vector<64x64xf32>
    %70 = vector.broadcast %61 : vector<1x64xf32> to vector<64x64xf32>
    %71 = arith.addf %69, %70 : vector<64x64xf32>
    %cst_30 = arith.constant 0.000000e+00 : f32
    %72 = vector.broadcast %cst_30 : f32 to vector<64x64xf32>
    %73 = arith.maximumf %71, %72 : vector<64x64xf32>
    %c1_i32_31 = arith.constant 1 : i32
    %74 = tpu.dynamic_rotate %73 by %c1_i32_31 dim 0 : vector<64x64xf32>, i32 -> vector<64x64xf32>
    %cst_32 = arith.constant 0.000000e+00 : f32
    %75 = vector.shape_cast %18 : vector<64x1xi1> to vector<64x1xi1>
    %76 = vector.broadcast %75 : vector<64x1xi1> to vector<64x64xi1>
    %77 = vector.broadcast %cst_32 : f32 to vector<64x64xf32>
    %78 = arith.select %76, %77, %74 : vector<64x64xi1>, vector<64x64xf32>
    %c0_33 = arith.constant 0 : index
    %c0_34 = arith.constant 0 : index
    %c0_35 = arith.constant 0 : index
    %79 = vector.load %arg3[%c0_33, %c0_34, %c0_35] : memref<13x64x64xbf16, #tpu.memory_space<vmem>>, vector<1x64x64xbf16>
    %80 = vector.shape_cast %79 : vector<1x64x64xbf16> to vector<64x64xbf16>
    %81 = arith.truncf %78 : vector<64x64xf32> to vector<64x64xbf16>
    %cst_36 = arith.constant dense<0.000000e+00> : vector<64x64xf32>
    %82 = tpu.matmul %81, %80, %cst_36 {dimension_numbers = #tpu.dot_dimension_numbers<[1], [0], [0], [1], [0, 0, 1, 1], [], []>} : vector<64x64xbf16>, vector<64x64xbf16>, vector<64x64xf32> -> vector<64x64xf32>
    %c1_37 = arith.constant 1 : index
    %c0_38 = arith.constant 0 : index
    %c0_39 = arith.constant 0 : index
    %83 = vector.load %arg3[%c1_37, %c0_38, %c0_39] : memref<13x64x64xbf16, #tpu.memory_space<vmem>>, vector<1x64x64xbf16>
    %84 = vector.shape_cast %83 : vector<1x64x64xbf16> to vector<64x64xbf16>
    %85 = arith.truncf %67 : vector<64x64xf32> to vector<64x64xbf16>
    %cst_40 = arith.constant dense<0.000000e+00> : vector<64x64xf32>
    %86 = tpu.matmul %85, %84, %cst_40 {dimension_numbers = #tpu.dot_dimension_numbers<[1], [0], [0], [1], [0, 0, 1, 1], [], []>} : vector<64x64xbf16>, vector<64x64xbf16>, vector<64x64xf32> -> vector<64x64xf32>
    %87 = arith.addf %82, %86 : vector<64x64xf32>
    %c2_41 = arith.constant 2 : index
    %c0_42 = arith.constant 0 : index
    %c0_43 = arith.constant 0 : index
    %88 = vector.load %arg3[%c2_41, %c0_42, %c0_43] : memref<13x64x64xbf16, #tpu.memory_space<vmem>>, vector<1x64x64xbf16>
    %89 = vector.shape_cast %88 : vector<1x64x64xbf16> to vector<64x64xbf16>
    %90 = arith.truncf %73 : vector<64x64xf32> to vector<64x64xbf16>
    %cst_44 = arith.constant dense<0.000000e+00> : vector<64x64xf32>
    %91 = tpu.matmul %90, %89, %cst_44 {dimension_numbers = #tpu.dot_dimension_numbers<[1], [0], [0], [1], [0, 0, 1, 1], [], []>} : vector<64x64xbf16>, vector<64x64xbf16>, vector<64x64xf32> -> vector<64x64xf32>
    %92 = arith.addf %87, %91 : vector<64x64xf32>
    %c3_45 = arith.constant 3 : index
    %c0_46 = arith.constant 0 : index
    %c0_47 = arith.constant 0 : index
    %93 = vector.load %arg3[%c3_45, %c0_46, %c0_47] : memref<13x64x64xbf16, #tpu.memory_space<vmem>>, vector<1x64x64xbf16>
    %94 = vector.shape_cast %93 : vector<1x64x64xbf16> to vector<64x64xbf16>
    %95 = arith.truncf %67 : vector<64x64xf32> to vector<64x64xbf16>
    %cst_48 = arith.constant dense<0.000000e+00> : vector<64x64xf32>
    %96 = tpu.matmul %95, %94, %cst_48 {dimension_numbers = #tpu.dot_dimension_numbers<[1], [0], [0], [1], [0, 0, 1, 1], [], []>} : vector<64x64xbf16>, vector<64x64xbf16>, vector<64x64xf32> -> vector<64x64xf32>
    %c3_49 = arith.constant 3 : index
    %c0_50 = arith.constant 0 : index
    %97 = vector.load %arg6[%c3_49, %c0_50] : memref<16x128xf32, #tpu.memory_space<vmem>>, vector<1x64xf32>
    %98 = vector.broadcast %97 : vector<1x64xf32> to vector<64x64xf32>
    %99 = arith.mulf %92, %98 : vector<64x64xf32>
    %c4 = arith.constant 4 : index
    %c0_51 = arith.constant 0 : index
    %100 = vector.load %arg6[%c4, %c0_51] : memref<16x128xf32, #tpu.memory_space<vmem>>, vector<1x64xf32>
    %101 = vector.broadcast %100 : vector<1x64xf32> to vector<64x64xf32>
    %102 = arith.addf %99, %101 : vector<64x64xf32>
    %cst_52 = arith.constant 0.000000e+00 : f32
    %103 = vector.broadcast %cst_52 : f32 to vector<64x64xf32>
    %104 = arith.maximumf %102, %103 : vector<64x64xf32>
    %c1_i32_53 = arith.constant 1 : i32
    %105 = tpu.dynamic_rotate %104 by %c1_i32_53 dim 0 : vector<64x64xf32>, i32 -> vector<64x64xf32>
    %cst_54 = arith.constant 0.000000e+00 : f32
    %106 = vector.shape_cast %18 : vector<64x1xi1> to vector<64x1xi1>
    %107 = vector.broadcast %106 : vector<64x1xi1> to vector<64x64xi1>
    %108 = vector.broadcast %cst_54 : f32 to vector<64x64xf32>
    %109 = arith.select %107, %108, %105 : vector<64x64xi1>, vector<64x64xf32>
    %c4_55 = arith.constant 4 : index
    %c0_56 = arith.constant 0 : index
    %c0_57 = arith.constant 0 : index
    %110 = vector.load %arg3[%c4_55, %c0_56, %c0_57] : memref<13x64x64xbf16, #tpu.memory_space<vmem>>, vector<1x64x64xbf16>
    %111 = vector.shape_cast %110 : vector<1x64x64xbf16> to vector<64x64xbf16>
    %112 = arith.truncf %109 : vector<64x64xf32> to vector<64x64xbf16>
    %cst_58 = arith.constant dense<0.000000e+00> : vector<64x64xf32>
    %113 = tpu.matmul %112, %111, %cst_58 {dimension_numbers = #tpu.dot_dimension_numbers<[1], [0], [0], [1], [0, 0, 1, 1], [], []>} : vector<64x64xbf16>, vector<64x64xbf16>, vector<64x64xf32> -> vector<64x64xf32>
    %c5 = arith.constant 5 : index
    %c0_59 = arith.constant 0 : index
    %c0_60 = arith.constant 0 : index
    %114 = vector.load %arg3[%c5, %c0_59, %c0_60] : memref<13x64x64xbf16, #tpu.memory_space<vmem>>, vector<1x64x64xbf16>
    %115 = vector.shape_cast %114 : vector<1x64x64xbf16> to vector<64x64xbf16>
    %116 = arith.truncf %104 : vector<64x64xf32> to vector<64x64xbf16>
    %cst_61 = arith.constant dense<0.000000e+00> : vector<64x64xf32>
    %117 = tpu.matmul %116, %115, %cst_61 {dimension_numbers = #tpu.dot_dimension_numbers<[1], [0], [0], [1], [0, 0, 1, 1], [], []>} : vector<64x64xbf16>, vector<64x64xbf16>, vector<64x64xf32> -> vector<64x64xf32>
    %118 = arith.addf %113, %117 : vector<64x64xf32>
    %c63_i32 = arith.constant 63 : i32
    %119 = tpu.dynamic_rotate %104 by %c63_i32 dim 0 : vector<64x64xf32>, i32 -> vector<64x64xf32>
    %cst_62 = arith.constant 0.000000e+00 : f32
    %120 = vector.shape_cast %20 : vector<64x1xi1> to vector<64x1xi1>
    %121 = vector.broadcast %120 : vector<64x1xi1> to vector<64x64xi1>
    %122 = vector.broadcast %cst_62 : f32 to vector<64x64xf32>
    %123 = arith.select %121, %122, %119 : vector<64x64xi1>, vector<64x64xf32>
    %c6 = arith.constant 6 : index
    %c0_63 = arith.constant 0 : index
    %c0_64 = arith.constant 0 : index
    %124 = vector.load %arg3[%c6, %c0_63, %c0_64] : memref<13x64x64xbf16, #tpu.memory_space<vmem>>, vector<1x64x64xbf16>
    %125 = vector.shape_cast %124 : vector<1x64x64xbf16> to vector<64x64xbf16>
    %126 = arith.truncf %123 : vector<64x64xf32> to vector<64x64xbf16>
    %cst_65 = arith.constant dense<0.000000e+00> : vector<64x64xf32>
    %127 = tpu.matmul %126, %125, %cst_65 {dimension_numbers = #tpu.dot_dimension_numbers<[1], [0], [0], [1], [0, 0, 1, 1], [], []>} : vector<64x64xbf16>, vector<64x64xbf16>, vector<64x64xf32> -> vector<64x64xf32>
    %128 = arith.addf %118, %127 : vector<64x64xf32>
    %129 = arith.addf %128, %96 : vector<64x64xf32>
    %c5_66 = arith.constant 5 : index
    %c0_67 = arith.constant 0 : index
    %130 = vector.load %arg6[%c5_66, %c0_67] : memref<16x128xf32, #tpu.memory_space<vmem>>, vector<1x64xf32>
    %131 = vector.broadcast %130 : vector<1x64xf32> to vector<64x64xf32>
    %132 = arith.mulf %129, %131 : vector<64x64xf32>
    %c6_68 = arith.constant 6 : index
    %c0_69 = arith.constant 0 : index
    %133 = vector.load %arg6[%c6_68, %c0_69] : memref<16x128xf32, #tpu.memory_space<vmem>>, vector<1x64xf32>
    %134 = vector.broadcast %133 : vector<1x64xf32> to vector<64x64xf32>
    %135 = arith.addf %132, %134 : vector<64x64xf32>
    %cst_70 = arith.constant 0.000000e+00 : f32
    %136 = vector.broadcast %cst_70 : f32 to vector<64x64xf32>
    %137 = arith.maximumf %135, %136 : vector<64x64xf32>
    %c1_i32_71 = arith.constant 1 : i32
    %138 = tpu.dynamic_rotate %137 by %c1_i32_71 dim 0 : vector<64x64xf32>, i32 -> vector<64x64xf32>
    %cst_72 = arith.constant 0.000000e+00 : f32
    %139 = vector.shape_cast %18 : vector<64x1xi1> to vector<64x1xi1>
    %140 = vector.broadcast %139 : vector<64x1xi1> to vector<64x64xi1>
    %141 = vector.broadcast %cst_72 : f32 to vector<64x64xf32>
    %142 = arith.select %140, %141, %138 : vector<64x64xi1>, vector<64x64xf32>
    %c7 = arith.constant 7 : index
    %c0_73 = arith.constant 0 : index
    %c0_74 = arith.constant 0 : index
    %143 = vector.load %arg3[%c7, %c0_73, %c0_74] : memref<13x64x64xbf16, #tpu.memory_space<vmem>>, vector<1x64x64xbf16>
    %144 = vector.shape_cast %143 : vector<1x64x64xbf16> to vector<64x64xbf16>
    %145 = arith.truncf %142 : vector<64x64xf32> to vector<64x64xbf16>
    %cst_75 = arith.constant dense<0.000000e+00> : vector<64x64xf32>
    %146 = tpu.matmul %145, %144, %cst_75 {dimension_numbers = #tpu.dot_dimension_numbers<[1], [0], [0], [1], [0, 0, 1, 1], [], []>} : vector<64x64xbf16>, vector<64x64xbf16>, vector<64x64xf32> -> vector<64x64xf32>
    %c8 = arith.constant 8 : index
    %c0_76 = arith.constant 0 : index
    %c0_77 = arith.constant 0 : index
    %147 = vector.load %arg3[%c8, %c0_76, %c0_77] : memref<13x64x64xbf16, #tpu.memory_space<vmem>>, vector<1x64x64xbf16>
    %148 = vector.shape_cast %147 : vector<1x64x64xbf16> to vector<64x64xbf16>
    %149 = arith.truncf %137 : vector<64x64xf32> to vector<64x64xbf16>
    %cst_78 = arith.constant dense<0.000000e+00> : vector<64x64xf32>
    %150 = tpu.matmul %149, %148, %cst_78 {dimension_numbers = #tpu.dot_dimension_numbers<[1], [0], [0], [1], [0, 0, 1, 1], [], []>} : vector<64x64xbf16>, vector<64x64xbf16>, vector<64x64xf32> -> vector<64x64xf32>
    %151 = arith.addf %146, %150 : vector<64x64xf32>
    %c63_i32_79 = arith.constant 63 : i32
    %152 = tpu.dynamic_rotate %137 by %c63_i32_79 dim 0 : vector<64x64xf32>, i32 -> vector<64x64xf32>
    %cst_80 = arith.constant 0.000000e+00 : f32
    %153 = vector.shape_cast %20 : vector<64x1xi1> to vector<64x1xi1>
    %154 = vector.broadcast %153 : vector<64x1xi1> to vector<64x64xi1>
    %155 = vector.broadcast %cst_80 : f32 to vector<64x64xf32>
    %156 = arith.select %154, %155, %152 : vector<64x64xi1>, vector<64x64xf32>
    %c9 = arith.constant 9 : index
    %c0_81 = arith.constant 0 : index
    %c0_82 = arith.constant 0 : index
    %157 = vector.load %arg3[%c9, %c0_81, %c0_82] : memref<13x64x64xbf16, #tpu.memory_space<vmem>>, vector<1x64x64xbf16>
    %158 = vector.shape_cast %157 : vector<1x64x64xbf16> to vector<64x64xbf16>
    %159 = arith.truncf %156 : vector<64x64xf32> to vector<64x64xbf16>
    %cst_83 = arith.constant dense<0.000000e+00> : vector<64x64xf32>
    %160 = tpu.matmul %159, %158, %cst_83 {dimension_numbers = #tpu.dot_dimension_numbers<[1], [0], [0], [1], [0, 0, 1, 1], [], []>} : vector<64x64xbf16>, vector<64x64xbf16>, vector<64x64xf32> -> vector<64x64xf32>
    %161 = arith.addf %151, %160 : vector<64x64xf32>
    %c7_84 = arith.constant 7 : index
    %c0_85 = arith.constant 0 : index
    %162 = vector.load %arg6[%c7_84, %c0_85] : memref<16x128xf32, #tpu.memory_space<vmem>>, vector<1x64xf32>
    %163 = vector.broadcast %162 : vector<1x64xf32> to vector<64x64xf32>
    %164 = arith.mulf %161, %163 : vector<64x64xf32>
    %c8_86 = arith.constant 8 : index
    %c0_87 = arith.constant 0 : index
    %165 = vector.load %arg6[%c8_86, %c0_87] : memref<16x128xf32, #tpu.memory_space<vmem>>, vector<1x64xf32>
    %166 = vector.broadcast %165 : vector<1x64xf32> to vector<64x64xf32>
    %167 = arith.addf %164, %166 : vector<64x64xf32>
    %cst_88 = arith.constant 0.000000e+00 : f32
    %168 = vector.broadcast %cst_88 : f32 to vector<64x64xf32>
    %169 = arith.maximumf %167, %168 : vector<64x64xf32>
    %c1_i32_89 = arith.constant 1 : i32
    %170 = tpu.dynamic_rotate %169 by %c1_i32_89 dim 0 : vector<64x64xf32>, i32 -> vector<64x64xf32>
    %cst_90 = arith.constant 0.000000e+00 : f32
    %171 = vector.shape_cast %18 : vector<64x1xi1> to vector<64x1xi1>
    %172 = vector.broadcast %171 : vector<64x1xi1> to vector<64x64xi1>
    %173 = vector.broadcast %cst_90 : f32 to vector<64x64xf32>
    %174 = arith.select %172, %173, %170 : vector<64x64xi1>, vector<64x64xf32>
    %c10 = arith.constant 10 : index
    %c0_91 = arith.constant 0 : index
    %c0_92 = arith.constant 0 : index
    %175 = vector.load %arg3[%c10, %c0_91, %c0_92] : memref<13x64x64xbf16, #tpu.memory_space<vmem>>, vector<1x64x64xbf16>
    %176 = vector.shape_cast %175 : vector<1x64x64xbf16> to vector<64x64xbf16>
    %177 = arith.truncf %174 : vector<64x64xf32> to vector<64x64xbf16>
    %cst_93 = arith.constant dense<0.000000e+00> : vector<64x64xf32>
    %178 = tpu.matmul %177, %176, %cst_93 {dimension_numbers = #tpu.dot_dimension_numbers<[1], [0], [0], [1], [0, 0, 1, 1], [], []>} : vector<64x64xbf16>, vector<64x64xbf16>, vector<64x64xf32> -> vector<64x64xf32>
    %c11 = arith.constant 11 : index
    %c0_94 = arith.constant 0 : index
    %c0_95 = arith.constant 0 : index
    %179 = vector.load %arg3[%c11, %c0_94, %c0_95] : memref<13x64x64xbf16, #tpu.memory_space<vmem>>, vector<1x64x64xbf16>
    %180 = vector.shape_cast %179 : vector<1x64x64xbf16> to vector<64x64xbf16>
    %181 = arith.truncf %169 : vector<64x64xf32> to vector<64x64xbf16>
    %cst_96 = arith.constant dense<0.000000e+00> : vector<64x64xf32>
    %182 = tpu.matmul %181, %180, %cst_96 {dimension_numbers = #tpu.dot_dimension_numbers<[1], [0], [0], [1], [0, 0, 1, 1], [], []>} : vector<64x64xbf16>, vector<64x64xbf16>, vector<64x64xf32> -> vector<64x64xf32>
    %183 = arith.addf %178, %182 : vector<64x64xf32>
    %c63_i32_97 = arith.constant 63 : i32
    %184 = tpu.dynamic_rotate %169 by %c63_i32_97 dim 0 : vector<64x64xf32>, i32 -> vector<64x64xf32>
    %cst_98 = arith.constant 0.000000e+00 : f32
    %185 = vector.shape_cast %20 : vector<64x1xi1> to vector<64x1xi1>
    %186 = vector.broadcast %185 : vector<64x1xi1> to vector<64x64xi1>
    %187 = vector.broadcast %cst_98 : f32 to vector<64x64xf32>
    %188 = arith.select %186, %187, %184 : vector<64x64xi1>, vector<64x64xf32>
    %c12 = arith.constant 12 : index
    %c0_99 = arith.constant 0 : index
    %c0_100 = arith.constant 0 : index
    %189 = vector.load %arg3[%c12, %c0_99, %c0_100] : memref<13x64x64xbf16, #tpu.memory_space<vmem>>, vector<1x64x64xbf16>
    %190 = vector.shape_cast %189 : vector<1x64x64xbf16> to vector<64x64xbf16>
    %191 = arith.truncf %188 : vector<64x64xf32> to vector<64x64xbf16>
    %cst_101 = arith.constant dense<0.000000e+00> : vector<64x64xf32>
    %192 = tpu.matmul %191, %190, %cst_101 {dimension_numbers = #tpu.dot_dimension_numbers<[1], [0], [0], [1], [0, 0, 1, 1], [], []>} : vector<64x64xbf16>, vector<64x64xbf16>, vector<64x64xf32> -> vector<64x64xf32>
    %193 = arith.addf %183, %192 : vector<64x64xf32>
    %194 = arith.addf %129, %193 : vector<64x64xf32>
    %c0_102 = arith.constant 0 : index
    %c0_103 = arith.constant 0 : index
    %195 = vector.load %arg5[%c0_102, %c0_103] : memref<8x64xbf16, #tpu.memory_space<vmem>>, vector<8x64xbf16>
    %196 = arith.truncf %194 : vector<64x64xf32> to vector<64x64xbf16>
    %cst_104 = arith.constant dense<0.000000e+00> : vector<8x64xf32>
    %197 = tpu.matmul %195, %196, %cst_104 {dimension_numbers = #tpu.dot_dimension_numbers<[1], [0], [0], [1], [0, 0, 1, 1], [], []>} : vector<8x64xbf16>, vector<64x64xbf16>, vector<8x64xf32> -> vector<8x64xf32>
    %c0_105 = arith.constant 0 : index
    %c0_106 = arith.constant 0 : index
    %198 = vector.load %arg4[%c0_105, %c0_106] : memref<64x128xbf16, #tpu.memory_space<vmem>>, vector<64x128xbf16>
    %199 = arith.truncf %197 : vector<8x64xf32> to vector<8x64xbf16>
    %cst_107 = arith.constant dense<0.000000e+00> : vector<8x128xf32>
    %200 = tpu.matmul %199, %198, %cst_107 {dimension_numbers = #tpu.dot_dimension_numbers<[1], [0], [0], [1], [0, 0, 1, 1], [], []>} : vector<8x64xbf16>, vector<64x128xbf16>, vector<8x128xf32> -> vector<8x128xf32>
    %c9_108 = arith.constant 9 : index
    %c0_109 = arith.constant 0 : index
    %201 = vector.load %arg6[%c9_108, %c0_109] : memref<16x128xf32, #tpu.memory_space<vmem>>, vector<1x128xf32>
    %202 = vector.broadcast %201 : vector<1x128xf32> to vector<8x128xf32>
    %203 = arith.addf %200, %202 : vector<8x128xf32>
    %c0_110 = arith.constant 0 : index
    %c0_111 = arith.constant 0 : index
    %204 = vector.load %arg7[%c0_110, %c0_111] : memref<8x128xf32, #tpu.memory_space<vmem>>, vector<8x128xf32>
    tpu.vector_store %arg7[%c0_110, %c0_111], %203 {strides = array<i32>} : memref<8x128xf32, #tpu.memory_space<vmem>>, vector<8x128xf32>,
    return
  }
  func.func @transform_0(%arg0: i32) -> (i32, i32) {
    %c0_i32 = arith.constant 0 : i32
    %c0_i32_0 = arith.constant 0 : i32
    return %arg0, %c0_i32 : i32, i32
  }
  func.func @transform_1(%arg0: i32) -> (i32, i32, i32) {
    %c0_i32 = arith.constant 0 : i32
    %c0_i32_0 = arith.constant 0 : i32
    %c0_i32_1 = arith.constant 0 : i32
    %c0_i32_2 = arith.constant 0 : i32
    return %c0_i32, %c0_i32_0, %c0_i32_1 : i32, i32, i32
  }
  func.func @transform_2(%arg0: i32) -> (i32, i32, i32) {
    %c0_i32 = arith.constant 0 : i32
    %c0_i32_0 = arith.constant 0 : i32
    %c0_i32_1 = arith.constant 0 : i32
    %c0_i32_2 = arith.constant 0 : i32
    return %c0_i32, %c0_i32_0, %c0_i32_1 : i32, i32, i32
  }
  func.func @transform_3(%arg0: i32) -> (i32, i32) {
    %c0_i32 = arith.constant 0 : i32
    %c0_i32_0 = arith.constant 0 : i32
    %c0_i32_1 = arith.constant 0 : i32
    return %c0_i32, %c0_i32_0 : i32, i32
  }
  func.func @transform_4(%arg0: i32) -> (i32, i32) {
    %c0_i32 = arith.constant 0 : i32
    %c0_i32_0 = arith.constant 0 : i32
    %c0_i32_1 = arith.constant 0 : i32
    return %c0_i32, %c0_i32_0 : i32, i32
  }
  func.func @transform_5(%arg0: i32) -> (i32, i32) {
    %c0_i32 = arith.constant 0 : i32
    %c0_i32_0 = arith.constant 0 : i32
    %c0_i32_1 = arith.constant 0 : i32
    return %c0_i32, %c0_i32_0 : i32, i32
  }
  func.func @transform_6(%arg0: i32) -> (i32, i32) {
    %c0_i32 = arith.constant 0 : i32
    %c0_i32_0 = arith.constant 0 : i32
    return %arg0, %c0_i32 : i32, i32
  }
}

</mosaic_0001>

<bundles_post_ra>
// kernel: _forward_impl.1
= control target key start
LH: loop header
LB: loop body
LE: loop exit
PB: predicated region body
PF: predicated region fallthrough
CT: control target
= control target key end

     0   :  { %vm199_vm0 = vcmask 392192   ;;  %v24_v45 = vlaneseq  ;;  %vm633_vm1 = vcmask 523264   ;;  %s3628_s1 = inlined_call_operand.vmem [shape: bf16[4,48,64], index: 1, kind: input, shape index: {}]   ;;  %s3629_s5 = inlined_call_operand.vmem [shape: f32[16,128], index: 5, kind: input, shape index: {}]   ;;  %s3630_s0 = inlined_call_operand.vmem [shape: bf16[64,48], index: 0, kind: input, shape index: {}]   ;;  %s3631_s2 = inlined_call_operand.vmem [shape: bf16[13,64,64], index: 2, kind: input, shape index: {}]   ;;  %s3632_s3 = inlined_call_operand.vmem [shape: bf16[64,128], index: 3, kind: input, shape index: {}]   ;;  %s3633_s4 = inlined_call_operand.vmem [shape: bf16[8,64], index: 4, kind: input, shape index: {}]   ;;  %s3634_s6 = inlined_call_operand.vmem [shape: f32[8,128], index: 6, kind: output, shape index: {}]  }
   0x1   :  { %v2430_v0 = vld [vmem:[%s3628_s1 + $0x10] sm:$0xff]  ;;  %v2436_v1 = vld [vmem:[%s3628_s1 + $0x40] sm:$0xff]  ;;  %v2429_v2 = vld [vmem:[%s3628_s1 + $0x8] sm:$0xff] }
   0x2   :  { %2496 = vmatpush.bf16.msra.mxu3 %v2430_v0  ;;  %v2433_v3 = vld [vmem:[%s3628_s1 + $0x28] sm:$0xff]  ;;  %217 = vmatpush.bf16.msra.mxu0 %v2430_v0  ;;  %v2435_v4 = vld [vmem:[%s3628_s1 + $0x38] sm:$0xff]  ;;  %v2428_v5 = vld [vmem:[%s3628_s1] sm:$0xff]  ;;  %v2663_v54 = vshrl.u32 %v24_v45, 7 }
   0x3   :  { %341 = vmatpush.bf16.msra.mxu2 %v2436_v1  ;;  %279 = vmatpush.bf16.msra.mxu1 %v2433_v3  ;;  %v2432_v6 = vld [vmem:[%s3628_s1 + $0x20] sm:$0xff]  ;;  %v2434_v7 = vld [vmem:[%s3628_s1 + $0x30] sm:$0xff]  ;;  %v2439_v8 = vld [vmem:[%s3628_s1 + $0x58] sm:$0xff] }
   0x4   :  { %v2431_v9 = vld [vmem:[%s3628_s1 + $0x18] sm:$0xff]  ;;  %v2426_v10 = vld [vmem:[%s3630_s0 + $0x10] sm:$0xff]  ;;  %v2424_v11 = vld [vmem:[%s3630_s0] sm:$0xff]  ;;  %v2674_v61 = vadd.s32 16, %v2663_v54  ;;  %vm3638_vm3 = vcmp.lt.s32.totalorder %v2663_v54, 1  ;;  %vm3639_vm11 = vcmp.lt.s32.totalorder %v2663_v54, 7 }
   0x5   :  { %v2438_v12 = vld [vmem:[%s3628_s1 + $0x50] sm:$0xff]  ;;  %v2437_v13 = vld [vmem:[%s3628_s1 + $0x48] sm:$0xff]  ;;  %v2427_v14 = vld [vmem:[%s3630_s0 + $0x18] sm:$0xff] }
   0x6   :  { %2497 = vmatpush.bf16.msra.mxu3 %v2429_v2  ;;  %218 = vmatpush.bf16.msra.mxu0 %v2429_v2  ;;  %v2425_v15 = vld [vmem:[%s3630_s0 + $0x8] sm:$0xff]  ;;  %v2451_v17 = vld [vmem:[%s3631_s2 + $0x58] sm:$0xff]  ;;  %v2450_v21 = vld [vmem:[%s3631_s2 + $0x50] sm:$0xff] }
   0x7   :  { %342 = vmatpush.bf16.msra.mxu2 %v2435_v4  ;;  %280 = vmatpush.bf16.msra.mxu1 %v2432_v6  ;;  %v2449_v22 = vld [vmem:[%s3631_s2 + $0x48] sm:$0xff]  ;;  %v2448_v24 = vld [vmem:[%s3631_s2 + $0x40] sm:$0xff] }
   0x8   :  { %v2633_v29 = vld [vmem:[%s3629_s5] ss:$0 sm:$0xff]  ;;  %v2658_v49 = vld [vmem:[%s3629_s5 + $0x1] ss:$0 sm:$0xff]  ;;  %v2668_v56 = vld [vmem:[%s3629_s5 + $0x2] ss:$0 sm:$0xff] }
   0xa   :  { %2498 = vmatpush.bf16.msra.mxu3 %v2428_v5  ;;  %219 = vmatpush.bf16.msra.mxu0 %v2428_v5  ;;  %v51_v5 = vand.u32 7, %v2674_v61 }
   0xb   :  { %343 = vmatpush.bf16.msra.mxu2 %v2434_v7  ;;  %281 = vmatpush.bf16.msra.mxu1 %v2431_v9 }
   0xc   :  { %vm2699_vm2 = vcmp.eq.s32.totalorder %v51_v5, 0  ;;  %vm3110_vm14 = vcmp.eq.s32.totalorder %v51_v5, 7 }
   0xd   :  { %1982 = vmatmul.msk.bf16.vlgmr.msra.gmra.mxu3 %vm199_vm0, %v2426_v10  ;;  %1980 = vmatmul.msk.bf16.vlgmr.msra.gmra.mxu0 %vm199_vm0, %v2424_v11 }
   0xe   :  { %403 = vmatpush.bf16.msrb.mxu3 %v2439_v8  ;;  %2024 = vmatmul.msk.bf16.vlgmr.msra.gmra.mxu2 %vm199_vm0, %v2424_v11 }
   0xf   :  { %2002 = vmatmul.msk.bf16.vlgmr.msra.gmra.mxu1 %vm199_vm0, %v2424_v11  ;;  %793 = vmatpush.bf16.msrb.mxu2 %v2451_v17 }
  0x12   :  { %404 = vmatpush.bf16.msrb.mxu3 %v2438_v12 }
  0x13   :  { %794 = vmatpush.bf16.msrb.mxu2 %v2450_v21 }
  0x16   :  { %405 = vmatpush.bf16.msrb.mxu3 %v2437_v13 }
  0x17   :  { %795 = vmatpush.bf16.msrb.mxu2 %v2449_v22 }
  0x1b   :  { %796 = vmatpush.bf16.msrb.mxu2 %v2448_v24 }
  0x1d   :  { %1983 = vmatmul.msk.bf16.gmra.mxu3 %vm199_vm0, %v2427_v14  ;;  %1981 = vmatmul.msk.bf16.gmra.mxu0 %vm199_vm0, %v2425_v15 }
  0x1e   :  { %2025 = vmatmul.msk.bf16.gmra.mxu2 %vm199_vm0, %v2425_v15 }
  0x1f   :  { %2003 = vmatmul.msk.bf16.gmra.mxu1 %vm199_vm0, %v2425_v15 }
  0x2d   :  { %2046 = vmatmul.msk.bf16.vlgmr.msrb.gmra.mxu3 %vm199_vm0, %v2424_v11 }
  0x2e   :  { %2026 = vmatmul.msk.bf16.gmra.mxu2 %vm199_vm0, %v2426_v10 }
  0x2f   :  { %2004 = vmatmul.msk.bf16.gmra.mxu1 %vm199_vm0, %v2426_v10 }
  0x3d   :  { %2047 = vmatmul.msk.bf16.gmra.mxu3 %vm199_vm0, %v2425_v15  ;;  %v2693_v15 = vadd.s32 24, %v2663_v54 }
  0x3e   :  { %2027 = vmatmul.msk.bf16.gmra.mxu2 %vm199_vm0, %v2427_v14 }
  0x3f   :  { %2005 = vmatmul.msk.bf16.gmra.mxu1 %vm199_vm0, %v2427_v14 }
  0x4d   :  { %2048 = vmatmul.msk.bf16.gmra.mxu3 %vm199_vm0, %v2426_v10 }
  0x5d   :  { %2049 = vmatmul.msk.bf16.gmra.mxu3 %vm199_vm0, %v2427_v14 }
  0x8a   :  { %v2626_v27 = vpop.f32.mrf.mxu0 }
  0x8c   :  { %v283_v19 = vpop.f32.mrf.mxu1 }
  0x8d   :  { %v2636_v30 = vadd.f32 %v2633_v29, %v283_v19 }
  0x8f   :  { %v303_v34 = vmax.f32 %v2636_v30, 0.0 }
  0x90   :  { %v2608_v16 = vpop.f32.mrf.mxu3 }
  0x91   :  { %v345_v20 = vpop.f32.mrf.mxu2 }
  0x92   :  { %v346_v31 = vadd.f32 %v2633_v29, %v345_v20  ;;  %v2643_v38 = vpop.f32.mrf.mxu0  ;;  %v3652_v20 = vmov 0 }
  0x93   :  { %v3653_v20 = vsel %vm2699_vm2, 4294967295, %v3652_v20 }
  0x94   :  { %v285_v25 = vpop.f32.mrf.mxu1  ;;  %v365_v35 = vmax.f32 %v346_v31, 0.0 }
  0x95   :  { %v2646_v39 = vadd.f32 %v2633_v29, %v285_v25 }
  0x96   :  { %v492_v41 = vmax.f32 %v303_v34, %v365_v35 }
  0x97   :  { %v304_v43 = vmax.f32 %v2646_v39, 0.0 }
  0x98   :  { %v2613_v18 = vpop.f32.mrf.mxu3 }
  0x99   :  { %v347_v26 = vpop.f32.mrf.mxu2 }
  0x9a   :  { %v348_v40 = vadd.f32 %v2633_v29, %v347_v26  ;;  %v226_v55 = vpop.f32.mrf.mxu0 }
  0x9b   :  { %v227_v6 = vadd.f32 %v2633_v29, %v226_v55 }
  0x9c   :  { %v288_v32 = vpop.f32.mrf.mxu1  ;;  %v366_v44 = vmax.f32 %v348_v40, 0.0 }
  0x9d   :  { %v289_v58 = vadd.f32 %v2633_v29, %v288_v32  ;;  %v243_v21 = vmax.f32 %v227_v6, 0.0 }
  0x9e   :  { %v493_v52 = vmax.f32 %v304_v43, %v366_v44 }
  0x9f   :  { %v305_v0 = vmax.f32 %v289_v58, 0.0 }
  0xa0   :  { %v2621_v23 = vpop.f32.mrf.mxu3 }
  0xa1   :  { %v350_v33 = vpop.f32.mrf.mxu2 }
  0xa2   :  { %v351_v59 = vadd.f32 %v2633_v29, %v350_v33  ;;  %v228_v22 = vpop.f32.mrf.mxu0 }
  0xa3   :  { %v229_v40 = vadd.f32 %v2633_v29, %v228_v22 }
  0xa4   :  { %v290_v46 = vpop.f32.mrf.mxu1  ;;  %v367_v1 = vmax.f32 %v351_v59, 0.0 }
  0xa5   :  { %v2688_v10 = vadd.f32 %v2633_v29, %v290_v46  ;;  %v244_v58 = vmax.f32 %v229_v40, 0.0 }
  0xa6   :  { %v494_v14 = vmax.f32 %v305_v0, %v367_v1  ;;  %v2447_v1 = vld [vmem:[%s3631_s2 + $0x38] sm:$0xff] }
  0xa7   :  { %v306_v25 = vmax.f32 %v2688_v10, 0.0  ;;  %650 = vmatpush.bf16.msrb.mxu0 %v2447_v1  ;;  %v2442_v10 = vld [vmem:[%s3631_s2 + $0x10] sm:$0xff] }
  0xa8   :  { %v2628_v28 = vpop.f32.mrf.mxu3 }
  0xa9   :  { %v352_v47 = vpop.f32.mrf.mxu2 }
  0xaa   :  { %v353_v11 = vadd.f32 %v2633_v29, %v352_v47 }
  0xac   :  { %v293_v7 = vpop.f32.mrf.mxu1  ;;  %v368_v26 = vmax.f32 %v353_v11, 0.0 }
  0xad   :  { %v2719_v45 = vadd.f32 %v2633_v29, %v293_v7 }
  0xae   :  { %v495_v47 = vmax.f32 %v306_v25, %v368_v26 }
  0xb0   :  { %v407_v36 = vpop.f32.mrf.mxu3 }
  0xb1   :  { %v2641_v37 = vadd.f32 %v2633_v29, %v407_v36  ;;  %v355_v8 = vpop.f32.mrf.mxu2  ;;  %v58_v36 = vand.u32 7, %v2693_v15 }
  0xb2   :  { %v356_v46 = vadd.f32 %v2633_v29, %v355_v8 }
  0xb3   :  { %v427_v42 = vmax.f32 %v2641_v37, 0.0  ;;  %vm2728_vm4 = vcmp.eq.s32.totalorder %v58_v36, 0  ;;  %v3660_v37 = vmov 0  ;;  %vm3116_vm15 = vcmp.eq.s32.totalorder %v58_v36, 7 }
  0xb4   :  { %v369_v6 = vmax.f32 %v356_v46, 0.0 }
  0xb5   :  { %v500_v48 = vmax.f32 %v492_v41, %v427_v42 }
  0xb7   :  { %v536_v57 = vmul.f32 %v2658_v49, %v500_v48 }
  0xb8   :  { %v409_v50 = vpop.f32.mrf.mxu3 }
  0xb9   :  { %v410_v51 = vadd.f32 %v2633_v29, %v409_v50  ;;  %v2678_v63 = vadd.f32 %v2668_v56, %v536_v57 }
  0xbb   :  { %v428_v53 = vmax.f32 %v410_v51, 0.0  ;;  %v552_v13 = vmax.f32 %v2678_v63, 0.0  ;;  %v295_v51 = vpop.f32.mrf.mxu1 }
  0xbc   :  { %v2771_v40 = vadd.f32 %v2633_v29, %v295_v51  ;;  %v2786_v51 = vadd.s32 40, %v2663_v54 }
  0xbd   :  { %v501_v60 = vmax.f32 %v493_v52, %v428_v53  ;;  %v2695_v17 = vrot.slane %v428_v53, 7  ;;  %v357_v52 = vpop.f32.mrf.mxu2  ;;  %v2443_v53 = vld [vmem:[%s3631_s2 + $0x18] sm:$0xff] }
  0xbe   :  { %715 = vmatpush.bf16.msrb.mxu1 %v2443_v53 }
  0xbf   :  { %v537_v62 = vmul.f32 %v2658_v49, %v501_v60 }
  0xc0   :  { %v412_v2 = vpop.f32.mrf.mxu3 }
  0xc1   :  { %v2681_v3 = vadd.f32 %v2668_v56, %v537_v62  ;;  %v413_v4 = vadd.f32 %v2633_v29, %v412_v2  ;;  %v2455_v2 = vld [vmem:[%s3631_s2 + $0x78] sm:$0xff] }
  0xc2   :  { %863 = vmatpush.bf16.msra.mxu3 %v2455_v2  ;;  %716 = vmatpush.bf16.msrb.mxu1 %v2442_v10  ;;  %v308_v2 = vmax.f32 %v2771_v40, 0.0  ;;  %v2440_v10 = vld [vmem:[%s3631_s2] sm:$0xff] }
  0xc3   :  { %v553_v9 = vmax.f32 %v2681_v3, 0.0  ;;  %v429_v12 = vmax.f32 %v413_v4, 0.0  ;;  %v307_v4 = vmax.f32 %v2719_v45, 0.0  ;;  %v2844_v45 = vrot.slane %v427_v42, 7 }
  0xc4   :  { %v224_v42 = vadd.f32 %v2633_v29, %v2643_v38  ;;  %v237_v38 = vadd.f32 %v2633_v29, %v2621_v23 }
  0xc5   :  { %v437_v19 = vrot.slane %v429_v12, 7  ;;  %v749_v24 = vpack.c.bf16 %v553_v9, %v552_v13  ;;  %v502_v32 = vmax.f32 %v494_v14, %v429_v12 }
  0xc7   :  { %v449_v31 = vsel %vm3638_vm3, %v2695_v17, %v437_v19  ;;  %2122 = vmatmul.msk.bf16.vlgmr.msrb.gmra.mxu2 %vm633_vm1, %v749_v24  ;;  %v538_v55 = vmul.f32 %v2658_v49, %v502_v32  ;;  %v2454_v32 = vld [vmem:[%s3631_s2 + $0x70] sm:$0xff] }
  0xc8   :  { %v470_v33 = vsel %vm2699_vm2, 0.0, %v449_v31  ;;  %v414_v35 = vpop.f32.mrf.mxu3  ;;  %v2446_v31 = vld [vmem:[%s3631_s2 + $0x30] sm:$0xff]  ;;  %864 = vmatpush.bf16.msra.mxu3 %v2454_v32 }
  0xc9   :  { %v478_v41 = vmax.f32 %v470_v33, %v243_v21  ;;  %v415_v44 = vadd.f32 %v2633_v29, %v414_v35  ;;  %v2752_v14 = vadd.f32 %v2668_v56, %v538_v55  ;;  %v232_v33 = vadd.f32 %v2633_v29, %v2608_v16  ;;  %651 = vmatpush.bf16.msrb.mxu0 %v2446_v31  ;;  %v2445_v16 = vld [vmem:[%s3631_s2 + $0x28] sm:$0xff]  ;;  %v2452_v31 = vld [vmem:[%s3631_s2 + $0x60] sm:$0xff] }
  0xca   :  { %v496_v35 = vmax.f32 %v307_v4, %v369_v6 }
  0xcb   :  { %v486_v48 = vmax.f32 %v478_v41, %v305_v0  ;;  %v430_v50 = vmax.f32 %v415_v44, 0.0  ;;  %v2734_v0 = vadd.s32 32, %v2663_v54  ;;  %v358_v44 = vadd.f32 %v2633_v29, %v357_v52 }
  0xcd   :  { %v513_v59 = vmul.f32 %v2658_v49, %v486_v48  ;;  %v438_v60 = vrot.slane %v430_v50, 7  ;;  %v503_v62 = vmax.f32 %v495_v47, %v430_v50  ;;  %v3637_v24 = vand.u32 7, %v2734_v0  ;;  %v2441_v48 = vld [vmem:[%s3631_s2 + $0x8] sm:$0xff]  ;;  %652 = vmatpush.bf16.msrb.mxu0 %v2445_v16 }
  0xce   :  { %v2453_v50 = vld [vmem:[%s3631_s2 + $0x68] sm:$0xff]  ;;  %717 = vmatpush.bf16.msrb.mxu1 %v2441_v48  ;;  %v370_v6 = vmax.f32 %v358_v44, 0.0 }
  0xcf   :  { %v539_v7 = vmul.f32 %v2658_v49, %v503_v62  ;;  %v448_v8 = vsel %vm3638_vm3, %v437_v19, %v438_v60  ;;  %v522_v21 = vadd.f32 %v2668_v56, %v513_v59  ;;  %vm2791_vm5 = vcmp.eq.s32.totalorder %v3637_v24, 0  ;;  %v360_v59 = vpop.f32.mrf.mxu2  ;;  %865 = vmatpush.bf16.msra.mxu3 %v2453_v50 }
  0xd0   :  { %v471_v11 = vsel %vm2728_vm4, 0.0, %v448_v8  ;;  %v417_v12 = vpop.f32.mrf.mxu3  ;;  %v245_v62 = vmax.f32 %v232_v33, 0.0  ;;  %v234_v33 = vadd.f32 %v2633_v29, %v2613_v18  ;;  %v361_v44 = vadd.f32 %v2633_v29, %v360_v59 }
  0xd1   :  { %v479_v22 = vmax.f32 %v471_v11, %v244_v58  ;;  %v418_v19 = vadd.f32 %v2633_v29, %v417_v12  ;;  %v2758_v26 = vadd.f32 %v2668_v56, %v539_v7  ;;  %v298_v58 = vpop.f32.mrf.mxu1  ;;  %v2806_v11 = vadd.s32 8, %v2663_v54 }
  0xd2   :  { %718 = vmatpush.bf16.msrb.mxu1 %v2440_v10  ;;  %v497_v16 = vmax.f32 %v308_v2, %v370_v6  ;;  %v2839_v6 = vadd.s32 48, %v2663_v54  ;;  %v371_v10 = vmax.f32 %v361_v44, 0.0 }
  0xd3   :  { %v487_v41 = vmax.f32 %v479_v22, %v306_v25  ;;  %v431_v46 = vmax.f32 %v418_v19, 0.0  ;;  %v555_v47 = vmax.f32 %v2758_v26, 0.0  ;;  %v554_v25 = vmax.f32 %v2752_v14, 0.0  ;;  %866 = vmatpush.bf16.msra.mxu3 %v2452_v31 }
  0xd4   :  { %v3636_v22 = vand.u32 7, %v2786_v51  ;;  %v3635_v44 = vand.u32 7, %v2839_v6 }
  0xd5   :  { %v514_v52 = vmul.f32 %v2658_v49, %v487_v41  ;;  %v439_v55 = vrot.slane %v431_v46, 7  ;;  %v750_v1 = vpack.c.bf16 %v555_v47, %v554_v25  ;;  %v504_v8 = vmax.f32 %v496_v35, %v431_v46 }
  0xd6   :  { %v2823_v41 = vadd.f32 %v2633_v29, %v298_v58  ;;  %v530_v46 = vmax.f32 %v522_v21, 0.0  ;;  %vm2832_vm6 = vcmp.eq.s32.totalorder %v3636_v22, 0  ;;  %vm2883_vm8 = vcmp.eq.s32.totalorder %v3635_v44, 0 }
  0xd7   :  { %v447_v7 = vsel %vm3638_vm3, %v438_v60, %v439_v55  ;;  %2123 = vmatmul.msk.bf16.gmra.mxu2 %vm633_vm1, %v750_v1  ;;  %v2444_v60 = vld [vmem:[%s3631_s2 + $0x20] sm:$0xff]  ;;  %v523_v32 = vadd.f32 %v2668_v56, %v514_v52  ;;  %v540_v50 = vmul.f32 %v2658_v49, %v504_v8  ;;  %v44_v52 = vand.u32 7, %v2806_v11  ;;  %v362_v31 = vpop.f32.mrf.mxu2  ;;  %v2458_v11 = vld [vmem:[%s3631_s2 + $0x90] sm:$0xff] }
  0xd8   :  { %v472_v12 = vsel %vm2791_vm5, 0.0, %v447_v7  ;;  %v419_v19 = vpop.f32.mrf.mxu3  ;;  %653 = vmatpush.bf16.msrb.mxu0 %v2444_v60  ;;  %v246_v8 = vmax.f32 %v234_v33, 0.0  ;;  %v37_v44 = vand.u32 7, %v2663_v54 }
  0xd9   :  { %v480_v35 = vmax.f32 %v472_v12, %v245_v62  ;;  %v420_v40 = vadd.f32 %v2633_v29, %v419_v19  ;;  %v531_v48 = vmax.f32 %v523_v32, 0.0  ;;  %v300_v60 = vpop.f32.mrf.mxu1  ;;  %v2851_v32 = vadd.f32 %v2668_v56, %v540_v50 }
  0xda   :  { %vm2856_vm7 = vcmp.eq.s32.totalorder %v44_v52, 0  ;;  %v301_v50 = vadd.f32 %v2633_v29, %v300_v60  ;;  %v2892_v60 = vadd.s32 56, %v2663_v54  ;;  %vm2913_vm9 = vcmp.eq.s32.totalorder %v37_v44, 0 }
  0xdb   :  { %v432_v1 = vmax.f32 %v420_v40, 0.0  ;;  %v488_v18 = vmax.f32 %v480_v35, %v307_v4  ;;  %v2836_v59 = vpack.c.bf16 %v531_v48, %v530_v46  ;;  %v309_v4 = vmax.f32 %v2823_v41, 0.0 }
  0xdc   :  { %v3661_v37 = vsel %vm2856_vm7, 4294967295, %v3660_v37  ;;  %vm3065_vm12 = vcmp.eq.s32.totalorder %v37_v44, 7  ;;  %vm3072_vm13 = vcmp.eq.s32.totalorder %v44_v52, 7 }
  0xdd   :  { %v440_v21 = vrot.slane %v432_v1, 7  ;;  %v505_v62 = vmax.f32 %v497_v16, %v432_v1  ;;  %v515_v7 = vmul.f32 %v2658_v49, %v488_v18  ;;  %v498_v16 = vmax.f32 %v309_v4, %v371_v10 }
  0xde   :  { %v556_v18 = vmax.f32 %v2851_v32, 0.0 }
  0xdf   :  { %v446_v12 = vsel %vm3638_vm3, %v439_v55, %v440_v21  ;;  %v541_v19 = vmul.f32 %v2658_v49, %v505_v62  ;;  %v524_v35 = vadd.f32 %v2668_v56, %v515_v7  ;;  %v450_v55 = vsel %vm3638_vm3, %v2844_v45, %v2695_v17 }
  0xe0   :  { %v473_v33 = vsel %vm2832_vm6, 0.0, %v446_v12  ;;  %v422_v40 = vpop.f32.mrf.mxu3  ;;  %v363_v17 = vadd.f32 %v2633_v29, %v362_v31  ;;  %v469_v12 = vsel %vm2856_vm7, 0.0, %v450_v55  ;;  %v564_v26 = vrot.slane %v556_v18, 7 }
  0xe1   :  { %v481_v41 = vmax.f32 %v473_v33, %v246_v8  ;;  %v423_v46 = vadd.f32 %v2633_v29, %v422_v40  ;;  %v2871_v48 = vadd.f32 %v2668_v56, %v541_v19  ;;  %v242_v8 = vmax.f32 %v224_v42, 0.0 }
  0xe2   :  { %v310_v42 = vmax.f32 %v301_v50, 0.0  ;;  %v372_v55 = vmax.f32 %v363_v17, 0.0  ;;  %v532_v17 = vmax.f32 %v524_v35, 0.0  ;;  %v561_v35 = vrot.slane %v553_v9, 7 }
  0xe3   :  { %v433_v1 = vmax.f32 %v423_v46, 0.0  ;;  %v557_v62 = vmax.f32 %v2871_v48, 0.0  ;;  %v489_v7 = vmax.f32 %v481_v41, %v308_v2  ;;  %v247_v2 = vmax.f32 %v237_v38, 0.0 }
  0xe4   :  { %v477_v41 = vmax.f32 %v469_v12, %v242_v8  ;;  %v499_v8 = vmax.f32 %v310_v42, %v372_v55 }
  0xe5   :  { %v441_v23 = vrot.slane %v433_v1, 7  ;;  %v751_v10 = vpack.c.bf16 %v557_v62, %v556_v18  ;;  %v516_v31 = vmul.f32 %v2658_v49, %v489_v7  ;;  %v506_v40 = vmax.f32 %v498_v16, %v433_v1 }
  0xe6   :  { %v86_v7 = vand.u32 7, %v2892_v60  ;;  %v222_v16 = vadd.f32 %v2633_v29, %v2626_v27  ;;  %v565_v14 = vrot.slane %v557_v62, 7 }
  0xe7   :  { %v445_v33 = vsel %vm3638_vm3, %v440_v21, %v441_v23  ;;  %2124 = vmatmul.msk.bf16.gmra.mxu2 %vm633_vm1, %v751_v10  ;;  %v525_v24 = vadd.f32 %v2668_v56, %v516_v31  ;;  %v239_v21 = vadd.f32 %v2633_v29, %v2628_v28  ;;  %v542_v12 = vmul.f32 %v2658_v49, %v506_v40 }
  0xe8   :  { %v474_v46 = vsel %vm2883_vm8, 0.0, %v445_v33  ;;  %v424_v22 = vpop.f32.mrf.mxu3  ;;  %vm2921_vm10 = vcmp.eq.s32.totalorder %v86_v7, 0 }
  0xe9   :  { %v482_v38 = vmax.f32 %v474_v46, %v247_v2  ;;  %v425_v50 = vadd.f32 %v2633_v29, %v424_v22  ;;  %v533_v1 = vmax.f32 %v525_v24, 0.0  ;;  %v485_v2 = vmax.f32 %v477_v41, %v304_v43 }
  0xea   :  { %v3664_v22 = vmov 0  ;;  %v248_v39 = vmax.f32 %v239_v21, 0.0  ;;  %v241_v43 = vmax.f32 %v222_v16, 0.0  ;;  %v550_v41 = vadd.f32 %v2668_v56, %v542_v12 }
  0xeb   :  { %v434_v10 = vmax.f32 %v425_v50, 0.0  ;;  %v490_v33 = vmax.f32 %v482_v38, %v309_v4  ;;  %v3665_v22 = vsel %vm2913_vm9, 4294967295, %v3664_v22  ;;  %v2917_v28 = vpack.c.bf16 %v533_v1, %v532_v17 }
  0xec   :  { %v512_v46 = vmul.f32 %v2658_v49, %v485_v2  ;;  %v558_v17 = vmax.f32 %v550_v41, 0.0  ;;  %v562_v41 = vrot.slane %v554_v25, 7 }
  0xed   :  { %v442_v29 = vrot.slane %v434_v10, 7  ;;  %v507_v24 = vmax.f32 %v499_v8, %v434_v10  ;;  %v517_v4 = vmul.f32 %v2658_v49, %v490_v33 }
  0xee   :  { %v521_v10 = vadd.f32 %v2668_v56, %v512_v46 }
  0xef   :  { %v444_v31 = vsel %vm3638_vm3, %v441_v23, %v442_v29  ;;  %v451_v55 = vsel %vm3638_vm3, %v442_v29, %v2844_v45  ;;  %v543_v40 = vmul.f32 %v2658_v49, %v507_v24  ;;  %v526_v9 = vadd.f32 %v2668_v56, %v517_v4 }
  0xf0   :  { %v468_v38 = vsel %vm2913_vm9, 0.0, %v451_v55  ;;  %v475_v3 = vsel %vm2921_vm10, 0.0, %v444_v31  ;;  %v560_v45 = vrot.slane %v552_v13, 7  ;;  %v529_v4 = vmax.f32 %v521_v10, 0.0  ;;  %v2466_v10 = vld [vmem:[%s3631_s2 + $0xd0] sm:$0xff] }
  0xf1   :  { %v476_v50 = vmax.f32 %v468_v38, %v241_v43  ;;  %v483_v23 = vmax.f32 %v475_v3, %v248_v39  ;;  %v551_v21 = vadd.f32 %v2668_v56, %v543_v40  ;;  %v534_v31 = vmax.f32 %v526_v9, 0.0 }
  0xf2   :  { %v574_v12 = vsel %vm3638_vm3, %v560_v45, %v561_v35  ;;  %v573_v38 = vsel %vm3638_vm3, %v561_v35, %v562_v41 }
  0xf3   :  { %v484_v16 = vmax.f32 %v476_v50, %v303_v34  ;;  %v559_v1 = vmax.f32 %v551_v21, 0.0  ;;  %v491_v8 = vmax.f32 %v483_v23, %v310_v42  ;;  %v577_v42 = vsel %vm2856_vm7, 0.0, %v574_v12 }
  0xf4   :  { %v578_v9 = vsel %vm2699_vm2, 0.0, %v573_v38 }
  0xf5   :  { %v567_v33 = vrot.slane %v559_v1, 7  ;;  %v752_v2 = vpack.c.bf16 %v559_v1, %v558_v17  ;;  %v511_v29 = vmul.f32 %v2658_v49, %v484_v16  ;;  %v518_v24 = vmul.f32 %v2658_v49, %v491_v8  ;;  %v2462_v16 = vld [vmem:[%s3631_s2 + $0xb0] sm:$0xff]  ;;  %v2460_v1 = vld [vmem:[%s3631_s2 + $0xa0] sm:$0xff]  ;;  %v2467_v8 = vld [vmem:[%s3631_s2 + $0xd8] sm:$0xff] }
  0xf6   :  { %1190 = vmatpush.bf16.msra.mxu2 %v2467_v8 }
  0xf7   :  { %v575_v63 = vsel %vm3638_vm3, %v567_v33, %v560_v45  ;;  %v520_v30 = vadd.f32 %v2668_v56, %v511_v29  ;;  %v527_v34 = vadd.f32 %v2668_v56, %v518_v24  ;;  %2125 = vmatmul.msk.bf16.gmra.mxu2 %vm633_vm1, %v752_v2  ;;  %v563_v56 = vrot.slane %v555_v47, 7  ;;  %v2464_v2 = vld [vmem:[%s3631_s2 + $0xc0] sm:$0xff] }
  0xf8   :  { %v576_v13 = vsel %vm2913_vm9, 0.0, %v575_v63  ;;  %v570_v47 = vsel %vm3638_vm3, %v564_v26, %v565_v14 }
  0xf9   :  { %v592_v39 = vpack.c.bf16 %v577_v42, %v576_v13  ;;  %v528_v43 = vmax.f32 %v520_v30, 0.0  ;;  %v535_v49 = vmax.f32 %v527_v34, 0.0  ;;  %v572_v46 = vsel %vm3638_vm3, %v562_v41, %v563_v56  ;;  %v3035_v13 = vld [vmem:[%s3629_s5 + $0x3] ss:$0 sm:$0xff] }
  0xfa   :  { %v579_v3 = vsel %vm2728_vm4, 0.0, %v572_v46  ;;  %v571_v25 = vsel %vm3638_vm3, %v563_v56, %v564_v26  ;;  %v581_v35 = vsel %vm2832_vm6, 0.0, %v570_v47  ;;  %1191 = vmatpush.bf16.msra.mxu2 %v2466_v10 }
  0xfb   :  { %2094 = vmatmul.msk.bf16.vlgmr.msrb.gmra.mxu1 %vm633_vm1, %v592_v39  ;;  %v605_v55 = vpack.c.bf16 %v529_v4, %v528_v43  ;;  %v608_v40 = vpack.c.bf16 %v535_v49, %v534_v31  ;;  %v593_v50 = vpack.c.bf16 %v579_v3, %v578_v9  ;;  %v580_v23 = vsel %vm2791_vm5, 0.0, %v571_v25  ;;  %v3041_v31 = vld [vmem:[%s3629_s5 + $0x4] ss:$0 sm:$0xff] }
  0xfc   :  { %v594_v21 = vpack.c.bf16 %v581_v35, %v580_v23 }
  0xfd   :  { %2074 = vmatmul.msk.bf16.vlgmr.msrb.gmra.mxu0 %vm633_vm1, %v605_v55  ;;  %2150 = vmatmul.msk.bf16.vlgmr.msra.gmra.mxu3 %vm633_vm1, %v605_v55 }
 0x10b   :  { %2095 = vmatmul.msk.bf16.gmra.mxu1 %vm633_vm1, %v593_v50 }
 0x10d   :  { %2075 = vmatmul.msk.bf16.gmra.mxu0 %vm633_vm1, %v2836_v59  ;;  %2151 = vmatmul.msk.bf16.gmra.mxu3 %vm633_vm1, %v2836_v59  ;;  %v566_v59 = vrot.slane %v558_v17, 7  ;;  %v2461_v17 = vld [vmem:[%s3631_s2 + $0xa8] sm:$0xff] }
 0x10f   :  { %v568_v32 = vsel %vm3638_vm3, %v566_v59, %v567_v33  ;;  %v569_v48 = vsel %vm3638_vm3, %v565_v14, %v566_v59  ;;  %v2465_v33 = vld [vmem:[%s3631_s2 + $0xc8] sm:$0xff] }
 0x110   :  { %v583_v18 = vsel %vm2921_vm10, 0.0, %v568_v32  ;;  %v582_v62 = vsel %vm2883_vm8, 0.0, %v569_v48  ;;  %1192 = vmatpush.bf16.msra.mxu2 %v2465_v33 }
 0x111   :  { %v595_v45 = vpack.c.bf16 %v583_v18, %v582_v62  ;;  %v2459_v62 = vld [vmem:[%s3631_s2 + $0x98] sm:$0xff] }
 0x112   :  { %1071 = vmatpush.bf16.msra.mxu1 %v2459_v62 }
 0x114   :  { %1193 = vmatpush.bf16.msra.mxu2 %v2464_v2 }
 0x116   :  { %1072 = vmatpush.bf16.msra.mxu1 %v2458_v11 }
 0x11b   :  { %2096 = vmatmul.msk.bf16.gmra.mxu1 %vm633_vm1, %v594_v21 }
 0x11d   :  { %2076 = vmatmul.msk.bf16.gmra.mxu0 %vm633_vm1, %v2917_v28  ;;  %2152 = vmatmul.msk.bf16.gmra.mxu3 %vm633_vm1, %v2917_v28  ;;  %v2463_v28 = vld [vmem:[%s3631_s2 + $0xb8] sm:$0xff] }
 0x11e   :  { %1006 = vmatpush.bf16.msra.mxu0 %v2463_v28 }
 0x122   :  { %1007 = vmatpush.bf16.msra.mxu0 %v2462_v16 }
 0x126   :  { %1008 = vmatpush.bf16.msra.mxu0 %v2461_v17 }
 0x12a   :  { %1009 = vmatpush.bf16.msra.mxu0 %v2460_v1 }
 0x12b   :  { %2097 = vmatmul.msk.bf16.gmra.mxu1 %vm633_vm1, %v595_v45 }
 0x12d   :  { %2077 = vmatmul.msk.bf16.gmra.mxu0 %vm633_vm1, %v608_v40  ;;  %2153 = vmatmul.msk.bf16.gmra.mxu3 %vm633_vm1, %v608_v40 }
 0x14a   :  { %v798_v12 = vpop.f32.mrf.mxu2 }
 0x152   :  { %v800_v29 = vpop.f32.mrf.mxu2 }
 0x15a   :  { %v803_v4 = vpop.f32.mrf.mxu2 }
 0x162   :  { %v805_v14 = vpop.f32.mrf.mxu2 }
 0x16a   :  { %v808_v8 = vpop.f32.mrf.mxu2 }
 0x178   :  { %v720_v24 = vpop.f32.mrf.mxu1 }
 0x17a   :  { %v655_v63 = vpop.f32.mrf.mxu0 }
 0x17b   :  { %v721_v30 = vadd.f32 %v720_v24, %v655_v63 }
 0x17d   :  { %v818_v34 = vadd.f32 %v798_v12, %v721_v30 }
 0x17f   :  { %v890_v43 = vmul.f32 %v3035_v13, %v818_v34  ;;  %v2457_v34 = vld [vmem:[%s3631_s2 + $0x88] sm:$0xff] }
 0x180   :  { %v722_v42 = vpop.f32.mrf.mxu1  ;;  %1073 = vmatpush.bf16.msra.mxu1 %v2457_v34  ;;  %v3679_v34 = vand.u32 7, %v2786_v51 }
 0x181   :  { %v900_v40 = vadd.f32 %v3041_v31, %v890_v43  ;;  %v2456_v43 = vld [vmem:[%s3631_s2 + $0x80] sm:$0xff] }
 0x182   :  { %v657_v39 = vpop.f32.mrf.mxu0  ;;  %vm3148_vm3 = vcmp.eq.s32.totalorder %v3679_v34, 7  ;;  %v2475_v34 = vld [vmem:[%s3631_s2 + $0x118] sm:$0xff] }
 0x183   :  { %v723_v49 = vadd.f32 %v722_v42, %v657_v39  ;;  %v3046_v3 = vmax.f32 %v900_v40, 0.0  ;;  %1349 = vmatpush.bf16.msrb.mxu3 %v2475_v34 }
 0x184   :  { %1074 = vmatpush.bf16.msra.mxu1 %v2456_v43 }
 0x185   :  { %v819_v55 = vadd.f32 %v800_v29, %v723_v49  ;;  %v1096_v32 = vrot.slane %v3046_v3, 1  ;;  %v810_v49 = vpop.f32.mrf.mxu2 }
 0x187   :  { %v891_v56 = vmul.f32 %v3035_v13, %v819_v55 }
 0x188   :  { %v725_v41 = vpop.f32.mrf.mxu1 }
 0x189   :  { %v901_v46 = vadd.f32 %v3041_v31, %v891_v56 }
 0x18a   :  { %v660_v38 = vpop.f32.mrf.mxu0 }
 0x18b   :  { %v3048_v9 = vmax.f32 %v901_v46, 0.0  ;;  %v726_v50 = vadd.f32 %v725_v41, %v660_v38 }
 0x18d   :  { %v820_v26 = vadd.f32 %v803_v4, %v726_v50  ;;  %v962_v47 = vpack.c.bf16 %v3048_v9, %v3046_v3  ;;  %v1097_v23 = vrot.slane %v3048_v9, 1  ;;  %v917_v51 = vrot.slane %v3048_v9, 7 }
 0x18f   :  { %v892_v25 = vmul.f32 %v3035_v13, %v820_v26  ;;  %2186 = vmatmul.msk.bf16.vlgmr.msra.gmra.mxu0 %vm633_vm1, %v962_v47  ;;  %v1111_v1 = vsel %vm3639_vm11, %v1096_v32, %v1097_v23  ;;  %v3674_v26 = vmov 0 }
 0x190   :  { %v727_v35 = vpop.f32.mrf.mxu1  ;;  %v1129_v10 = vsel %vm3065_vm12, 0.0, %v1111_v1  ;;  %v3675_v26 = vsel %vm3116_vm15, 4294967295, %v3674_v26 }
 0x191   :  { %v902_v21 = vadd.f32 %v3041_v31, %v892_v25 }
 0x192   :  { %v662_v59 = vpop.f32.mrf.mxu0 }
 0x193   :  { %v3058_v48 = vmax.f32 %v902_v21, 0.0  ;;  %v728_v18 = vadd.f32 %v727_v35, %v662_v59  ;;  %v813_v59 = vpop.f32.mrf.mxu2 }
 0x195   :  { %v1098_v28 = vrot.slane %v3058_v48, 1  ;;  %v821_v16 = vadd.f32 %v805_v14, %v728_v18 }
 0x197   :  { %v893_v44 = vmul.f32 %v3035_v13, %v821_v16  ;;  %v1110_v12 = vsel %vm3639_vm11, %v1097_v23, %v1098_v28 }
 0x198   :  { %v730_v52 = vpop.f32.mrf.mxu1  ;;  %v1130_v33 = vsel %vm3072_vm13, 0.0, %v1110_v12 }
 0x199   :  { %v903_v2 = vadd.f32 %v3041_v31, %v893_v44  ;;  %v1146_v29 = vpack.c.bf16 %v1130_v33, %v1129_v10 }
 0x19a   :  { %v665_v24 = vpop.f32.mrf.mxu0 }
 0x19b   :  { %v3091_v63 = vmax.f32 %v903_v2, 0.0  ;;  %v731_v30 = vadd.f32 %v730_v52, %v665_v24  ;;  %2234 = vmatmul.msk.bf16.vlgmr.msra.gmra.mxu2 %vm633_vm1, %v1146_v29  ;;  %v815_v2 = vpop.f32.mrf.mxu2  ;;  %v3676_v29 = vand.u32 7, %v2734_v0  ;;  %v3677_v24 = vmov 0 }
 0x19d   :  { %v822_v42 = vadd.f32 %v808_v8, %v731_v30  ;;  %v963_v4 = vpack.c.bf16 %v3091_v63, %v3058_v48  ;;  %v1099_v56 = vrot.slane %v3091_v63, 1  ;;  %vm3142_vm0 = vcmp.eq.s32.totalorder %v3676_v29, 7 }
 0x19e   :  { %v3678_v24 = vsel %vm3142_vm0, 4294967295, %v3677_v24  ;;  %v919_v60 = vrot.slane %v3091_v63, 7 }
 0x19f   :  { %v894_v39 = vmul.f32 %v3035_v13, %v822_v42  ;;  %2187 = vmatmul.msk.bf16.gmra.mxu0 %vm633_vm1, %v963_v4  ;;  %v1109_v25 = vsel %vm3639_vm11, %v1098_v28, %v1099_v56  ;;  %v3680_v42 = vmov 0 }
 0x1a0   :  { %v732_v55 = vpop.f32.mrf.mxu1  ;;  %v1131_v23 = vsel %vm3110_vm14, 0.0, %v1109_v25  ;;  %v3681_v42 = vsel %vm3148_vm3, 4294967295, %v3680_v42 }
 0x1a1   :  { %v904_v40 = vadd.f32 %v3041_v31, %v894_v39 }
 0x1a2   :  { %v667_v41 = vpop.f32.mrf.mxu0 }
 0x1a3   :  { %v3106_v46 = vmax.f32 %v904_v40, 0.0  ;;  %v733_v38 = vadd.f32 %v732_v55, %v667_v41  ;;  %v916_v41 = vrot.slane %v3046_v3, 7 }
 0x1a5   :  { %v823_v14 = vadd.f32 %v810_v49, %v733_v38  ;;  %v1100_v47 = vrot.slane %v3106_v46, 1 }
 0x1a7   :  { %v895_v35 = vmul.f32 %v3035_v13, %v823_v14  ;;  %v1108_v61 = vsel %vm3639_vm11, %v1099_v56, %v1100_v47 }
 0x1a8   :  { %v735_v5 = vpop.f32.mrf.mxu1  ;;  %v1132_v15 = vsel %vm3116_vm15, 0.0, %v1108_v61 }
 0x1a9   :  { %v905_v36 = vadd.f32 %v3041_v31, %v895_v35  ;;  %v1147_v21 = vpack.c.bf16 %v1132_v15, %v1131_v23  ;;  %v3687_v15 = vmov 0 }
 0x1aa   :  { %v670_v18 = vpop.f32.mrf.mxu0 }
 0x1ab   :  { %v3131_v62 = vmax.f32 %v905_v36, 0.0  ;;  %v736_v28 = vadd.f32 %v735_v5, %v670_v18  ;;  %2235 = vmatmul.msk.bf16.gmra.mxu2 %vm633_vm1, %v1147_v21  ;;  %v3684_v5 = vand.u32 7, %v2839_v6  ;;  %v918_v18 = vrot.slane %v3058_v48, 7 }
 0x1ac   :  { %v920_v48 = vrot.slane %v3106_v46, 7 }
 0x1ad   :  { %v824_v16 = vadd.f32 %v813_v59, %v736_v28  ;;  %v964_v1 = vpack.c.bf16 %v3131_v62, %v3106_v46  ;;  %v1101_v12 = vrot.slane %v3131_v62, 1  ;;  %v921_v63 = vrot.slane %v3131_v62, 7 }
 0x1af   :  { %v896_v8 = vmul.f32 %v3035_v13, %v824_v16  ;;  %2188 = vmatmul.msk.bf16.gmra.mxu0 %vm633_vm1, %v964_v1  ;;  %v1107_v39 = vsel %vm3639_vm11, %v1100_v47, %v1101_v12 }
 0x1b0   :  { %v737_v11 = vpop.f32.mrf.mxu1  ;;  %v1133_v49 = vsel %vm3142_vm0, 0.0, %v1107_v39 }
 0x1b1   :  { %v906_v44 = vadd.f32 %v3041_v31, %v896_v8 }
 0x1b2   :  { %v672_v52 = vpop.f32.mrf.mxu0 }
 0x1b3   :  { %v914_v10 = vmax.f32 %v906_v44, 0.0  ;;  %v738_v33 = vadd.f32 %v737_v11, %v672_v52 }
 0x1b5   :  { %v825_v30 = vadd.f32 %v815_v2, %v738_v33  ;;  %v1102_v4 = vrot.slane %v914_v10, 1  ;;  %v922_v33 = vrot.slane %v914_v10, 7 }
 0x1b7   :  { %v897_v43 = vmul.f32 %v3035_v13, %v825_v30  ;;  %v1106_v0 = vsel %vm3639_vm11, %v1101_v12, %v1102_v4  ;;  %vm3682_vm11 = vcmp.lt.s32.totalorder %v2663_v54, 1 }
 0x1b8   :  { %v1134_v55 = vsel %vm3148_vm3, 0.0, %v1106_v0  ;;  %v930_v47 = vsel %vm3682_vm11, %v916_v41, %v917_v51  ;;  %vm3683_vm0 = vmmov %vm3682_vm11  ;;  %vm3177_vm3 = vcmp.eq.s32.totalorder %v3684_v5, 7  ;;  %vm3183_vm11 = vcmp.eq.s32.totalorder %v86_v7, 7  ;;  %v2479_v0 = vld [vmem:[%s3631_s2 + $0x138] sm:$0xff] }
 0x1b9   :  { %v907_v40 = vadd.f32 %v3041_v31, %v897_v43  ;;  %v1148_v56 = vpack.c.bf16 %v1134_v55, %v1133_v49  ;;  %v933_v9 = vsel %vm2856_vm7, 0.0, %v930_v47  ;;  %v3688_v15 = vsel %vm3183_vm11, 4294967295, %v3687_v15  ;;  %v2472_v43 = vld [vmem:[%s3631_s2 + $0x100] sm:$0xff]  ;;  %1516 = vmatpush.bf16.msrb.mxu1 %v2479_v0  ;;  %v868_v55 = vpop.f32.mrf.mxu3 }
 0x1bb   :  { %v915_v38 = vmax.f32 %v907_v40, 0.0  ;;  %2236 = vmatmul.msk.bf16.gmra.mxu2 %vm633_vm1, %v1148_v56  ;;  %v2477_v40 = vld [vmem:[%s3631_s2 + $0x128] sm:$0xff] }
 0x1bd   :  { %v923_v13 = vrot.slane %v915_v38, 7  ;;  %v965_v14 = vpack.c.bf16 %v915_v38, %v914_v10  ;;  %v1103_v35 = vrot.slane %v915_v38, 1  ;;  %v2474_v10 = vld [vmem:[%s3631_s2 + $0x110] sm:$0xff]  ;;  %v2476_v38 = vld [vmem:[%s3631_s2 + $0x120] sm:$0xff] }
 0x1be   :  { %1350 = vmatpush.bf16.msrb.mxu3 %v2474_v10 }
 0x1bf   :  { %2189 = vmatmul.msk.bf16.gmra.mxu0 %vm633_vm1, %v965_v14  ;;  %v931_v25 = vsel %vm3683_vm0, %v923_v13, %v916_v41  ;;  %vm3689_vm0 = vcmp.lt.s32.totalorder %v2663_v54, 7 }
 0x1c0   :  { %v932_v31 = vsel %vm2913_vm9, 0.0, %v931_v25  ;;  %v1105_v36 = vsel %vm3689_vm0, %v1102_v4, %v1103_v35  ;;  %vm3690_vm7 = vmmov %vm3689_vm0  ;;  %vm3691_vm0 = vcmp.lt.s32.totalorder %v2663_v54, 1  ;;  %v2473_v4 = vld [vmem:[%s3631_s2 + $0x108] sm:$0xff] }
 0x1c1   :  { %v949_v61 = vpack.c.bf16 %v933_v9, %v932_v31  ;;  %v1112_v21 = vsel %vm3690_vm7, %v1103_v35, %v1096_v32  ;;  %v1135_v6 = vsel %vm3177_vm3, 0.0, %v1105_v36  ;;  %v928_v28 = vsel %vm3691_vm0, %v918_v18, %v919_v60  ;;  %vm3692_vm9 = vmmov %vm3691_vm0  ;;  %v3258_v9 = vld [vmem:[%s3629_s5 + $0x5] ss:$0 sm:$0xff] }
 0x1c2   :  { %v1136_v59 = vsel %vm3183_vm11, 0.0, %v1112_v21  ;;  %v929_v3 = vsel %vm3692_vm9, %v917_v51, %v918_v18  ;;  %v935_v32 = vsel %vm2728_vm4, 0.0, %v928_v28  ;;  %vm3693_vm7 = vmmov %vm3691_vm0  ;;  %v927_v44 = vsel %vm3691_vm0, %v919_v60, %v920_v48  ;;  %1351 = vmatpush.bf16.msrb.mxu3 %v2473_v4  ;;  %v2478_v51 = vld [vmem:[%s3631_s2 + $0x130] sm:$0xff] }
 0x1c3   :  { %2206 = vmatmul.msk.bf16.vlgmr.msra.gmra.mxu1 %vm633_vm1, %v949_v61  ;;  %v1149_v7 = vpack.c.bf16 %v1136_v59, %v1135_v6  ;;  %v934_v16 = vsel %vm2699_vm2, 0.0, %v929_v3  ;;  %v926_v8 = vsel %vm3693_vm7, %v920_v48, %v921_v63  ;;  %v936_v11 = vsel %vm2791_vm5, 0.0, %v927_v44  ;;  %vm3694_vm9 = vmmov %vm3691_vm0  ;;  %v3265_v59 = vld [vmem:[%s3629_s5 + $0x6] ss:$0 sm:$0xff] }
 0x1c4   :  { %v950_v1 = vpack.c.bf16 %v935_v32, %v934_v16  ;;  %v937_v12 = vsel %vm2832_vm6, 0.0, %v926_v8  ;;  %v924_v62 = vsel %vm3694_vm9, %v922_v33, %v923_v13  ;;  %vm3695_vm2 = vmmov %vm3691_vm0  ;;  %1517 = vmatpush.bf16.msrb.mxu1 %v2478_v51  ;;  %v870_v13 = vpop.f32.mrf.mxu3 }
 0x1c5   :  { %v951_v52 = vpack.c.bf16 %v937_v12, %v936_v11  ;;  %v925_v46 = vsel %vm3695_vm2, %v921_v63, %v922_v33  ;;  %v939_v2 = vsel %vm2921_vm10, 0.0, %v924_v62  ;;  %vm3696_vm2 = vcmp.lt.s32.totalorder %v2663_v54, 7 }
 0x1c6   :  { %v938_v29 = vsel %vm2883_vm8, 0.0, %v925_v46  ;;  %1352 = vmatpush.bf16.msrb.mxu3 %v2472_v43  ;;  %vm3697_vm7 = vmmov %vm3696_vm2 }
 0x1c7   :  { %v952_v30 = vpack.c.bf16 %v939_v2, %v938_v29  ;;  %vm3698_vm0 = vmmov %vm3696_vm2 }
 0x1c8   :  { %1518 = vmatpush.bf16.msrb.mxu1 %v2477_v40  ;;  %vm3699_vm9 = vmmov %vm3698_vm0 }
 0x1cb   :  { %2237 = vmatmul.msk.bf16.gmra.mxu2 %vm633_vm1, %v1149_v7 }
 0x1cc   :  { %1519 = vmatpush.bf16.msrb.mxu1 %v2476_v38  ;;  %v873_v21 = vpop.f32.mrf.mxu3 }
 0x1d3   :  { %2207 = vmatmul.msk.bf16.gmra.mxu1 %vm633_vm1, %v950_v1 }
 0x1d4   :  { %v875_v12 = vpop.f32.mrf.mxu3 }
 0x1dc   :  { %v878_v51 = vpop.f32.mrf.mxu3 }
 0x1e3   :  { %2208 = vmatmul.msk.bf16.gmra.mxu1 %vm633_vm1, %v951_v52 }
 0x1f3   :  { %2209 = vmatmul.msk.bf16.gmra.mxu1 %vm633_vm1, %v952_v30 }
 0x20c   :  { %v1011_v39 = vpop.f32.mrf.mxu0 }
 0x214   :  { %v1013_v56 = vpop.f32.mrf.mxu0 }
 0x21c   :  { %v1016_v35 = vpop.f32.mrf.mxu0 }
 0x21e   :  { %v1195_v49 = vpop.f32.mrf.mxu2 }
 0x224   :  { %v1018_v3 = vpop.f32.mrf.mxu0 }
 0x226   :  { %v1197_v41 = vpop.f32.mrf.mxu2 }
 0x22c   :  { %v1021_v30 = vpop.f32.mrf.mxu0 }
 0x22e   :  { %v1200_v61 = vpop.f32.mrf.mxu2 }
 0x236   :  { %v1202_v63 = vpop.f32.mrf.mxu2 }
 0x23e   :  { %v1205_v43 = vpop.f32.mrf.mxu2 }
 0x240   :  { %v1076_v14 = vpop.f32.mrf.mxu1 }
 0x241   :  { %v1077_v47 = vadd.f32 %v1076_v14, %v1011_v39  ;;  %v2471_v39 = vld [vmem:[%s3631_s2 + $0xf8] sm:$0xff] }
 0x242   :  { %1414 = vmatpush.bf16.msrb.mxu0 %v2471_v39 }
 0x243   :  { %v1215_v25 = vadd.f32 %v1195_v49, %v1077_v47 }
 0x245   :  { %v3253_v31 = vadd.f32 %v1215_v25, %v868_v55 }
 0x247   :  { %v1233_v6 = vmul.f32 %v3258_v9, %v3253_v31 }
 0x248   :  { %v1078_v5 = vpop.f32.mrf.mxu1 }
 0x249   :  { %v1079_v36 = vadd.f32 %v1078_v5, %v1013_v56  ;;  %v1243_v18 = vadd.f32 %v3265_v59, %v1233_v6 }
 0x24b   :  { %v1216_v60 = vadd.f32 %v1197_v41, %v1079_v36  ;;  %v3273_v48 = vmax.f32 %v1243_v18, 0.0  ;;  %v2470_v41 = vld [vmem:[%s3631_s2 + $0xf0] sm:$0xff]  ;;  %v2469_v36 = vld [vmem:[%s3631_s2 + $0xe8] sm:$0xff]  ;;  %v1207_v18 = vpop.f32.mrf.mxu2 }
 0x24c   :  { %1415 = vmatpush.bf16.msrb.mxu0 %v2470_v41 }
 0x24d   :  { %v3267_v7 = vadd.f32 %v1216_v60, %v870_v13  ;;  %v1439_v34 = vrot.slane %v3273_v48, 1 }
 0x24f   :  { %v1234_v28 = vmul.f32 %v3258_v9, %v3267_v7 }
 0x250   :  { %v1081_v32 = vpop.f32.mrf.mxu1  ;;  %1416 = vmatpush.bf16.msrb.mxu0 %v2469_v36 }
 0x251   :  { %v1244_v16 = vadd.f32 %v3265_v59, %v1234_v28  ;;  %v1082_v1 = vadd.f32 %v1081_v32, %v1016_v35  ;;  %v880_v32 = vpop.f32.mrf.mxu3 }
 0x253   :  { %v3275_v8 = vmax.f32 %v1244_v16, 0.0  ;;  %v1217_v44 = vadd.f32 %v1200_v61, %v1082_v1 }
 0x255   :  { %v3277_v11 = vadd.f32 %v1217_v44, %v873_v21  ;;  %v1305_v52 = vpack.c.bf16 %v3275_v8, %v3273_v48  ;;  %v1440_v46 = vrot.slane %v3275_v8, 1  ;;  %v1023_v21 = vpop.f32.mrf.mxu0 }
 0x257   :  { %v1235_v33 = vmul.f32 %v3258_v9, %v3277_v11  ;;  %2270 = vmatmul.msk.bf16.vlgmr.msrb.gmra.mxu3 %vm633_vm1, %v1305_v52  ;;  %v1453_v0 = vsel %vm3696_vm2, %v1439_v34, %v1440_v46  ;;  %vm3700_vm2 = vmmov %vm3698_vm0 }
 0x258   :  { %v1083_v62 = vpop.f32.mrf.mxu1  ;;  %v1455_v13 = vsel %vm3065_vm12, 0.0, %v1453_v0 }
 0x259   :  { %v1245_v2 = vadd.f32 %v3265_v59, %v1235_v33  ;;  %v1084_v29 = vadd.f32 %v1083_v62, %v1018_v3  ;;  %v2468_v3 = vld [vmem:[%s3631_s2 + $0xe0] sm:$0xff] }
 0x25a   :  { %1417 = vmatpush.bf16.msrb.mxu0 %v2468_v3 }
 0x25b   :  { %v3287_v10 = vmax.f32 %v1245_v2, 0.0  ;;  %v1218_v4 = vadd.f32 %v1202_v63, %v1084_v29 }
 0x25d   :  { %v1441_v49 = vrot.slane %v3287_v10, 1  ;;  %v3297_v55 = vadd.f32 %v1218_v4, %v875_v12  ;;  %v1026_v2 = vpop.f32.mrf.mxu0  ;;  %v1210_v4 = vpop.f32.mrf.mxu2 }
 0x25f   :  { %v1452_v40 = vsel %vm3697_vm7, %v1440_v46, %v1441_v49  ;;  %v1236_v56 = vmul.f32 %v3258_v9, %v3297_v55  ;;  %vm3701_vm7 = vmmov %vm3698_vm0 }
 0x260   :  { %v1086_v38 = vpop.f32.mrf.mxu1  ;;  %v1456_v14 = vsel %vm3072_vm13, 0.0, %v1452_v40 }
 0x261   :  { %v1246_v47 = vadd.f32 %v3265_v59, %v1236_v56  ;;  %v1087_v25 = vadd.f32 %v1086_v38, %v1021_v30  ;;  %v1472_v35 = vpack.c.bf16 %v1456_v14, %v1455_v13 }
 0x263   :  { %v1219_v61 = vadd.f32 %v1205_v43, %v1087_v25  ;;  %2318 = vmatmul.msk.bf16.vlgmr.msrb.gmra.mxu1 %vm633_vm1, %v1472_v35  ;;  %v3312_v5 = vmax.f32 %v1246_v47, 0.0 }
 0x265   :  { %v3317_v6 = vadd.f32 %v1219_v61, %v878_v51  ;;  %v1306_v60 = vpack.c.bf16 %v3312_v5, %v3287_v10  ;;  %v1442_v63 = vrot.slane %v3312_v5, 1  ;;  %v1028_v25 = vpop.f32.mrf.mxu0 }
 0x267   :  { %v1237_v28 = vmul.f32 %v3258_v9, %v3317_v6  ;;  %2271 = vmatmul.msk.bf16.gmra.mxu3 %vm633_vm1, %v1306_v60  ;;  %v1451_v46 = vsel %vm3698_vm0, %v1441_v49, %v1442_v63  ;;  %v883_v49 = vpop.f32.mrf.mxu3  ;;  %v1212_v60 = vpop.f32.mrf.mxu2  ;;  %vm3702_vm0 = vnez %v3678_v24 }
 0x268   :  { %v1088_v16 = vpop.f32.mrf.mxu1  ;;  %v1457_v43 = vsel %vm3110_vm14, 0.0, %v1451_v46 }
 0x269   :  { %v1247_v1 = vadd.f32 %v3265_v59, %v1237_v28  ;;  %v1089_v44 = vadd.f32 %v1088_v16, %v1023_v21 }
 0x26b   :  { %v3329_v12 = vmax.f32 %v1247_v1, 0.0  ;;  %v1220_v52 = vadd.f32 %v1207_v18, %v1089_v44 }
 0x26d   :  { %v1443_v33 = vrot.slane %v3329_v12, 1  ;;  %v3332_v62 = vadd.f32 %v1220_v52, %v880_v32 }
 0x26f   :  { %v1238_v29 = vmul.f32 %v3258_v9, %v3332_v62  ;;  %v1450_v30 = vsel %vm3699_vm9, %v1442_v63, %v1443_v33  ;;  %v885_v3 = vpop.f32.mrf.mxu3  ;;  %vm3703_vm9 = vnez %v3681_v42 }
 0x270   :  { %v1091_v39 = vpop.f32.mrf.mxu1  ;;  %v1458_v0 = vsel %vm3116_vm15, 0.0, %v1450_v30  ;;  %vm3708_vm15 = vcmp.lt.s32.totalorder %v2663_v54, 7 }
 0x271   :  { %v1248_v51 = vadd.f32 %v3265_v59, %v1238_v29  ;;  %v1092_v40 = vadd.f32 %v1091_v39, %v1026_v2  ;;  %v1473_v56 = vpack.c.bf16 %v1458_v0, %v1457_v43  ;;  %v1260_v2 = vrot.slane %v3275_v8, 7 }
 0x273   :  { %v3345_v41 = vmax.f32 %v1248_v51, 0.0  ;;  %v1221_v38 = vadd.f32 %v1210_v4, %v1092_v40  ;;  %2319 = vmatmul.msk.bf16.gmra.mxu1 %vm633_vm1, %v1473_v56  ;;  %v1259_v4 = vrot.slane %v3273_v48, 7 }
 0x275   :  { %v3348_v13 = vadd.f32 %v1221_v38, %v883_v49  ;;  %v1307_v14 = vpack.c.bf16 %v3345_v41, %v3329_v12  ;;  %v1444_v61 = vrot.slane %v3345_v41, 1 }
 0x277   :  { %v1239_v47 = vmul.f32 %v3258_v9, %v3348_v13  ;;  %2272 = vmatmul.msk.bf16.gmra.mxu3 %vm633_vm1, %v1307_v14  ;;  %v1449_v1 = vsel %vm3700_vm2, %v1443_v33, %v1444_v61  ;;  %vm3704_vm2 = vcmp.lt.s32.totalorder %v2663_v54, 1 }
 0x278   :  { %v1093_v35 = vpop.f32.mrf.mxu1  ;;  %v1459_v52 = vsel %vm3702_vm0, 0.0, %v1449_v1  ;;  %v1273_v43 = vsel %vm3704_vm2, %v1259_v4, %v1260_v2  ;;  %vm3707_vm0 = vnez %v3661_v37 }
 0x279   :  { %v1249_v36 = vadd.f32 %v3265_v59, %v1239_v47  ;;  %v1094_v21 = vadd.f32 %v1093_v35, %v1028_v25  ;;  %v1276_v8 = vsel %vm3707_vm0, 0.0, %v1273_v43  ;;  %v1262_v47 = vrot.slane %v3312_v5, 7  ;;  %v2489_v43 = vld [vmem:[%s3631_s2 + $0x188] sm:$0xff] }
 0x27a   :  { %v1261_v35 = vrot.slane %v3287_v10, 7  ;;  %v1264_v5 = vrot.slane %v3345_v41, 7  ;;  %v1263_v10 = vrot.slane %v3329_v12, 7 }
 0x27b   :  { %v1257_v18 = vmax.f32 %v1249_v36, 0.0  ;;  %v1222_v28 = vadd.f32 %v1212_v60, %v1094_v21 }
 0x27d   :  { %v1445_v32 = vrot.slane %v1257_v18, 1  ;;  %v3357_v16 = vadd.f32 %v1222_v28, %v885_v3 }
 0x27f   :  { %v1240_v63 = vmul.f32 %v3258_v9, %v3357_v16  ;;  %v1448_v44 = vsel %vm3701_vm7, %v1444_v61, %v1445_v32  ;;  %vm3705_vm7 = vmmov %vm3704_vm2 }
 0x280   :  { %v1460_v46 = vsel %vm3703_vm9, 0.0, %v1448_v44  ;;  %vm3706_vm9 = vnez %v3665_v22  ;;  %vm3709_vm2 = vmmov %vm3708_vm15  ;;  %v1272_v48 = vsel %vm3705_vm7, %v1260_v2, %v1261_v35  ;;  %v2487_v2 = vld [vmem:[%s3631_s2 + $0x178] sm:$0xff] }
 0x281   :  { %v1250_v29 = vadd.f32 %v3265_v59, %v1240_v63  ;;  %v1474_v30 = vpack.c.bf16 %v1460_v46, %v1459_v52  ;;  %v1265_v63 = vrot.slane %v1257_v18, 7  ;;  %1667 = vmatpush.bf16.msrb.mxu2 %v2487_v2 }
 0x283   :  { %v1258_v33 = vmax.f32 %v1250_v29, 0.0  ;;  %2320 = vmatmul.msk.bf16.gmra.mxu1 %vm633_vm1, %v1474_v30  ;;  %v2485_v29 = vld [vmem:[%s3631_s2 + $0x168] sm:$0xff]  ;;  %v2484_v30 = vld [vmem:[%s3631_s2 + $0x160] sm:$0xff] }
 0x285   :  { %v1266_v9 = vrot.slane %v1258_v33, 7  ;;  %v1308_v39 = vpack.c.bf16 %v1258_v33, %v1257_v18  ;;  %v1446_v0 = vrot.slane %v1258_v33, 1  ;;  %v2486_v18 = vld [vmem:[%s3631_s2 + $0x170] sm:$0xff] }
 0x286   :  { %1668 = vmatpush.bf16.msrb.mxu2 %v2486_v18 }
 0x287   :  { %2273 = vmatmul.msk.bf16.gmra.mxu3 %vm633_vm1, %v1308_v39  ;;  %v1274_v51 = vsel %vm3705_vm7, %v1266_v9, %v1259_v4  ;;  %v1447_v56 = vsel %vm3708_vm15, %v1445_v32, %v1446_v0  ;;  %v1454_v49 = vsel %vm3709_vm2, %v1446_v0, %v1439_v34  ;;  %vm3710_vm15 = vmmov %vm3705_vm7  ;;  %vm3711_vm2 = vnez %v3653_v20  ;;  %v2491_v4 = vld [vmem:[%s3631_s2 + $0x198] sm:$0xff]  ;;  %v2490_v39 = vld [vmem:[%s3631_s2 + $0x190] sm:$0xff] }
 0x288   :  { %v1275_v59 = vsel %vm3706_vm9, 0.0, %v1274_v51  ;;  %v1461_v38 = vsel %vm3177_vm3, 0.0, %v1447_v56  ;;  %v1462_v14 = vsel %vm3183_vm11, 0.0, %v1454_v49  ;;  %v1271_v61 = vsel %vm3710_vm15, %v1261_v35, %v1262_v47  ;;  %vm3712_vm11 = vmmov %vm3705_vm7  ;;  %1834 = vmatpush.bf16.msra.mxu0 %v2491_v4  ;;  %v2488_v51 = vld [vmem:[%s3631_s2 + $0x180] sm:$0xff]  ;;  %v3458_v35 = vld [vmem:[%s3629_s5 + $0x8] ss:$0 sm:$0xff] }
 0x289   :  { %v1292_v40 = vpack.c.bf16 %v1276_v8, %v1275_v59  ;;  %v1475_v25 = vpack.c.bf16 %v1462_v14, %v1461_v38  ;;  %v1278_v34 = vsel %vm2728_vm4, 0.0, %v1271_v61  ;;  %v1277_v36 = vsel %vm3711_vm2, 0.0, %v1272_v48  ;;  %vm3713_vm15 = vmmov %vm3705_vm7  ;;  %v3452_v49 = vld [vmem:[%s3629_s5 + $0x7] ss:$0 sm:$0xff] }
 0x28a   :  { %v1293_v21 = vpack.c.bf16 %v1278_v34, %v1277_v36  ;;  %v1269_v60 = vsel %vm3712_vm11, %v1263_v10, %v1264_v5  ;;  %v1270_v28 = vsel %vm3713_vm15, %v1262_v47, %v1263_v10  ;;  %v1267_v41 = vsel %vm3705_vm7, %v1265_v63, %v1266_v9  ;;  %vm3714_vm2 = vmmov %vm3705_vm7  ;;  %1669 = vmatpush.bf16.msrb.mxu2 %v2485_v29  ;;  %v2483_v29 = vld [vmem:[%s3631_s2 + $0x158] sm:$0xff] }
 0x28b   :  { %2290 = vmatmul.msk.bf16.vlgmr.msrb.gmra.mxu0 %vm633_vm1, %v1292_v40  ;;  %v1280_v3 = vsel %vm2832_vm6, 0.0, %v1269_v60  ;;  %v1279_v32 = vsel %vm2791_vm5, 0.0, %v1270_v28  ;;  %v1268_v12 = vsel %vm3714_vm2, %v1264_v5, %v1265_v63  ;;  %v1282_v44 = vsel %vm2921_vm10, 0.0, %v1267_v41  ;;  %1732 = vmatpush.bf16.msra.mxu3 %v2483_v29 }
 0x28c   :  { %v1294_v1 = vpack.c.bf16 %v1280_v3, %v1279_v32  ;;  %v1281_v52 = vsel %vm2883_vm8, 0.0, %v1268_v12  ;;  %1835 = vmatpush.bf16.msra.mxu0 %v2490_v39  ;;  %vm3715_vm11 = vcmp.lt.s32.totalorder %v2663_v54, 7  ;;  %vm3719_vm15 = vnez %v3675_v26 }
 0x28d   :  { %v1295_v46 = vpack.c.bf16 %v1282_v44, %v1281_v52  ;;  %vm3716_vm2 = vmmov %vm3715_vm11 }
 0x28e   :  { %1670 = vmatpush.bf16.msrb.mxu2 %v2484_v30  ;;  %vm3721_vm7 = vmmov %vm3716_vm2 }
 0x290   :  { %1836 = vmatpush.bf16.msra.mxu0 %v2489_v43 }
 0x293   :  { %2321 = vmatmul.msk.bf16.gmra.mxu1 %vm633_vm1, %v1475_v25 }
 0x294   :  { %1837 = vmatpush.bf16.msra.mxu0 %v2488_v51  ;;  %v2482_v51 = vld [vmem:[%s3631_s2 + $0x150] sm:$0xff] }
 0x295   :  { %1733 = vmatpush.bf16.msra.mxu3 %v2482_v51 }
 0x29b   :  { %2291 = vmatmul.msk.bf16.gmra.mxu0 %vm633_vm1, %v1293_v21 }
 0x2ab   :  { %2292 = vmatmul.msk.bf16.gmra.mxu0 %vm633_vm1, %v1294_v1 }
 0x2bb   :  { %2293 = vmatmul.msk.bf16.gmra.mxu0 %vm633_vm1, %v1295_v46 }
 0x2da   :  { %v1354_v33 = vpop.f32.mrf.mxu3 }
 0x2e0   :  { %v1521_v9 = vpop.f32.mrf.mxu1 }
 0x2e2   :  { %v1356_v0 = vpop.f32.mrf.mxu3 }
 0x2e8   :  { %v1523_v59 = vpop.f32.mrf.mxu1 }
 0x2ea   :  { %v1359_v38 = vpop.f32.mrf.mxu3 }
 0x2f0   :  { %v1526_v14 = vpop.f32.mrf.mxu1 }
 0x2f2   :  { %v1361_v5 = vpop.f32.mrf.mxu3 }
 0x2f8   :  { %v1528_v32 = vpop.f32.mrf.mxu1 }
 0x2fa   :  { %v1364_v30 = vpop.f32.mrf.mxu3 }
 0x300   :  { %v1531_v39 = vpop.f32.mrf.mxu1 }
 0x302   :  { %v1366_v17 = vpop.f32.mrf.mxu3 }
 0x308   :  { %v1419_v8 = vpop.f32.mrf.mxu0 }
 0x309   :  { %v1420_v40 = vadd.f32 %v1419_v8, %v1354_v33 }
 0x30b   :  { %v1541_v56 = vadd.f32 %v1521_v9, %v1420_v40 }
 0x30d   :  { %v1551_v25 = vmul.f32 %v3452_v49, %v1541_v56 }
 0x30f   :  { %v1561_v34 = vadd.f32 %v3458_v35, %v1551_v25  ;;  %v2481_v25 = vld [vmem:[%s3631_s2 + $0x148] sm:$0xff] }
 0x310   :  { %v1421_v47 = vpop.f32.mrf.mxu0  ;;  %1734 = vmatpush.bf16.msra.mxu3 %v2481_v25 }
 0x311   :  { %v1422_v61 = vadd.f32 %v1421_v47, %v1356_v0  ;;  %v3463_v60 = vmax.f32 %v1561_v34, 0.0  ;;  %v2480_v34 = vld [vmem:[%s3631_s2 + $0x140] sm:$0xff] }
 0x313   :  { %v1542_v48 = vadd.f32 %v1523_v59, %v1422_v61  ;;  %v1757_v46 = vrot.slane %v3463_v60, 1 }
 0x314   :  { %1735 = vmatpush.bf16.msra.mxu3 %v2480_v34 }
 0x315   :  { %v1552_v36 = vmul.f32 %v3452_v49, %v1542_v48 }
 0x317   :  { %v1562_v21 = vadd.f32 %v3458_v35, %v1552_v36  ;;  %v1533_v36 = vpop.f32.mrf.mxu1 }
 0x318   :  { %v1424_v10 = vpop.f32.mrf.mxu0 }
 0x319   :  { %v3465_v28 = vmax.f32 %v1562_v21, 0.0  ;;  %v1425_v3 = vadd.f32 %v1424_v10, %v1359_v38 }
 0x31b   :  { %v1623_v1 = vpack.c.bf16 %v3465_v28, %v3463_v60  ;;  %v1543_v63 = vadd.f32 %v1526_v14, %v1425_v3  ;;  %v1758_v12 = vrot.slane %v3465_v28, 1 }
 0x31d   :  { %v1553_v41 = vmul.f32 %v3452_v49, %v1543_v63  ;;  %2354 = vmatmul.msk.bf16.vlgmr.msrb.gmra.mxu2 %vm633_vm1, %v1623_v1  ;;  %v1771_v4 = vsel %vm3715_vm11, %v1757_v46, %v1758_v12  ;;  %vm3722_vm11 = vnez %v3678_v24 }
 0x31e   :  { %v1773_v59 = vsel %vm3065_vm12, 0.0, %v1771_v4  ;;  %vm3717_vm12 = vmmov %vm3716_vm2 }
 0x31f   :  { %v1563_v44 = vadd.f32 %v3458_v35, %v1553_v41 }
 0x320   :  { %v1426_v52 = vpop.f32.mrf.mxu0 }
 0x321   :  { %v3474_v2 = vmax.f32 %v1563_v44, 0.0  ;;  %v1427_v18 = vadd.f32 %v1426_v52, %v1361_v5  ;;  %v1369_v52 = vpop.f32.mrf.mxu3 }
 0x323   :  { %v1759_v33 = vrot.slane %v3474_v2, 1  ;;  %v1544_v9 = vadd.f32 %v1528_v32, %v1427_v18 }
 0x325   :  { %v1770_v43 = vsel %vm3716_vm2, %v1758_v12, %v1759_v33  ;;  %v1554_v0 = vmul.f32 %v3452_v49, %v1544_v9  ;;  %v1536_v9 = vpop.f32.mrf.mxu1 }
 0x326   :  { %v1774_v8 = vsel %vm3072_vm13, 0.0, %v1770_v43  ;;  %vm3718_vm13 = vmmov %vm3716_vm2 }
 0x327   :  { %v1564_v40 = vadd.f32 %v3458_v35, %v1554_v0  ;;  %v1790_v56 = vpack.c.bf16 %v1774_v8, %v1773_v59 }
 0x328   :  { %v1429_v38 = vpop.f32.mrf.mxu0 }
 0x329   :  { %v3495_v14 = vmax.f32 %v1564_v40, 0.0  ;;  %v1430_v47 = vadd.f32 %v1429_v38, %v1364_v30  ;;  %2402 = vmatmul.msk.bf16.vlgmr.msra.gmra.mxu0 %vm633_vm1, %v1790_v56  ;;  %v1371_v8 = vpop.f32.mrf.mxu3 }
 0x32b   :  { %v1545_v61 = vadd.f32 %v1531_v39, %v1430_v47  ;;  %v1624_v45 = vpack.c.bf16 %v3495_v14, %v3474_v2  ;;  %v1760_v21 = vrot.slane %v3495_v14, 1  ;;  %v1580_v22 = vrot.slane %v3495_v14, 7 }
 0x32d   :  { %v1555_v48 = vmul.f32 %v3452_v49, %v1545_v61  ;;  %2355 = vmatmul.msk.bf16.gmra.mxu2 %vm633_vm1, %v1624_v45  ;;  %v1769_v41 = vsel %vm3717_vm12, %v1759_v33, %v1760_v21  ;;  %v1538_v47 = vpop.f32.mrf.mxu1  ;;  %vm3724_vm12 = vcmp.lt.s32.totalorder %v2663_v54, 1 }
 0x32e   :  { %v1775_v18 = vsel %vm3110_vm14, 0.0, %v1769_v41  ;;  %vm3720_vm14 = vmmov %vm3716_vm2  ;;  %vm3723_vm2 = vnez %v3681_v42 }
 0x32f   :  { %v1565_v5 = vadd.f32 %v3458_v35, %v1555_v48 }
 0x330   :  { %v1431_v10 = vpop.f32.mrf.mxu0 }
 0x331   :  { %v3510_v3 = vmax.f32 %v1565_v5, 0.0  ;;  %v1432_v32 = vadd.f32 %v1431_v10, %v1366_v17 }
 0x333   :  { %v1761_v1 = vrot.slane %v3510_v3, 1  ;;  %v1546_v63 = vadd.f32 %v1533_v36, %v1432_v32  ;;  %v1577_v32 = vrot.slane %v3463_v60, 7  ;;  %v1581_v14 = vrot.slane %v3510_v3, 7 }
 0x335   :  { %v1556_v12 = vmul.f32 %v3452_v49, %v1546_v63  ;;  %v1768_v44 = vsel %vm3718_vm13, %v1760_v21, %v1761_v1  ;;  %v1578_v21 = vrot.slane %v3465_v28, 7  ;;  %vm3725_vm13 = vmmov %vm3724_vm12 }
 0x336   :  { %v1776_v29 = vsel %vm3719_vm15, 0.0, %v1768_v44  ;;  %vm3726_vm15 = vmmov %vm3721_vm7 }
 0x337   :  { %v1566_v30 = vadd.f32 %v3458_v35, %v1556_v12  ;;  %v1791_v4 = vpack.c.bf16 %v1776_v29, %v1775_v18  ;;  %v1579_v29 = vrot.slane %v3474_v2, 7 }
 0x338   :  { %v1434_v39 = vpop.f32.mrf.mxu0 }
 0x339   :  { %v3523_v43 = vmax.f32 %v1566_v30, 0.0  ;;  %v1435_v33 = vadd.f32 %v1434_v39, %v1369_v52  ;;  %2403 = vmatmul.msk.bf16.gmra.mxu0 %vm633_vm1, %v1791_v4 }
 0x33b   :  { %v1547_v0 = vadd.f32 %v1536_v9, %v1435_v33  ;;  %v1625_v51 = vpack.c.bf16 %v3523_v43, %v3510_v3  ;;  %v1762_v26 = vrot.slane %v3523_v43, 1  ;;  %v1582_v2 = vrot.slane %v3523_v43, 7 }
 0x33d   :  { %v1557_v50 = vmul.f32 %v3452_v49, %v1547_v0  ;;  %2356 = vmatmul.msk.bf16.gmra.mxu2 %vm633_vm1, %v1625_v51  ;;  %v1767_v45 = vsel %vm3720_vm14, %v1761_v1, %v1762_v26  ;;  %vm3727_vm14 = vmmov %vm3721_vm7 }
 0x33e   :  { %v1777_v34 = vsel %vm3722_vm11, 0.0, %v1767_v45 }
 0x33f   :  { %v1567_v59 = vadd.f32 %v3458_v35, %v1557_v50 }
 0x340   :  { %v1436_v40 = vpop.f32.mrf.mxu0 }
 0x341   :  { %v1575_v56 = vmax.f32 %v1567_v59, 0.0  ;;  %v1437_v38 = vadd.f32 %v1436_v40, %v1371_v8 }
 0x343   :  { %v1763_v25 = vrot.slane %v1575_v56, 1  ;;  %v1548_v61 = vadd.f32 %v1538_v47, %v1437_v38  ;;  %v1583_v0 = vrot.slane %v1575_v56, 7 }
 0x345   :  { %v1558_v17 = vmul.f32 %v3452_v49, %v1548_v61  ;;  %v1766_v48 = vsel %vm3721_vm7, %v1762_v26, %v1763_v25  ;;  %v1591_v49 = vsel %vm3724_vm12, %v1577_v32, %v1578_v21  ;;  %vm3728_vm7 = vnez %v3688_v15 }
 0x346   :  { %v1778_v36 = vsel %vm3723_vm2, 0.0, %v1766_v48 }
 0x347   :  { %v1568_v5 = vadd.f32 %v3458_v35, %v1558_v17  ;;  %v1792_v10 = vpack.c.bf16 %v1778_v36, %v1777_v34  ;;  %v1594_v35 = vsel %vm3707_vm0, 0.0, %v1591_v49  ;;  %vm3729_vm0 = vmmov %vm3724_vm12  ;;  %v2495_v49 = vld [vmem:[%s3632_s3 + $0x18] sm:$0xff] }
 0x348   :  { %v1589_v4 = vsel %vm3729_vm0, %v1579_v29, %v1580_v22  ;;  %vm3732_vm11 = vmmov %vm3729_vm0  ;;  %1938 = vmatpush.bf16.msra.mxu2 %v2495_v49 }
 0x349   :  { %v1576_v63 = vmax.f32 %v1568_v5, 0.0  ;;  %2404 = vmatmul.msk.bf16.gmra.mxu0 %vm633_vm1, %v1792_v10  ;;  %v1596_v23 = vsel %vm2728_vm4, 0.0, %v1589_v4  ;;  %v1587_v9 = vsel %vm3732_vm11, %v1581_v14, %v1582_v2  ;;  %vm3733_vm2 = vmmov %vm3729_vm0 }
 0x34a   :  { %v1588_v39 = vsel %vm3733_vm2, %v1580_v22, %v1581_v14  ;;  %v1598_v57 = vsel %vm2832_vm6, 0.0, %v1587_v9  ;;  %vm3734_vm4 = vmmov %vm3729_vm0 }
 0x34b   :  { %v1584_v1 = vrot.slane %v1576_v63, 7  ;;  %v1626_v41 = vpack.c.bf16 %v1576_v63, %v1575_v56  ;;  %v1764_v42 = vrot.slane %v1576_v63, 1  ;;  %vm3735_vm12 = vmmov %vm3729_vm0 }
 0x34c   :  { %v1586_v3 = vsel %vm3735_vm12, %v1582_v2, %v1583_v0 }
 0x34d   :  { %v1592_v24 = vsel %vm3725_vm13, %v1584_v1, %v1577_v32  ;;  %2357 = vmatmul.msk.bf16.gmra.mxu2 %vm633_vm1, %v1626_v41  ;;  %v1765_v44 = vsel %vm3726_vm15, %v1763_v25, %v1764_v42  ;;  %v1772_v52 = vsel %vm3727_vm14, %v1764_v42, %v1757_v46  ;;  %v1585_v43 = vsel %vm3734_vm4, %v1583_v0, %v1584_v1  ;;  %v2494_v1 = vld [vmem:[%s3632_s3 + $0x10] sm:$0xff] }
 0x34e   :  { %v1593_v28 = vsel %vm3706_vm9, 0.0, %v1592_v24  ;;  %v1779_v18 = vsel %vm3177_vm3, 0.0, %v1765_v44  ;;  %v1780_v37 = vsel %vm3728_vm7, 0.0, %v1772_v52  ;;  %vm3730_vm9 = vmmov %vm3729_vm0  ;;  %vm3731_vm3 = vnez %v3653_v20  ;;  %1939 = vmatpush.bf16.msra.mxu2 %v2494_v1  ;;  %v2493_v24 = vld [vmem:[%s3632_s3 + $0x8] sm:$0xff] }
 0x34f   :  { %v1610_v12 = vpack.c.bf16 %v1594_v35, %v1593_v28  ;;  %v1793_v30 = vpack.c.bf16 %v1780_v37, %v1779_v18  ;;  %v1590_v60 = vsel %vm3730_vm9, %v1578_v21, %v1579_v29  ;;  %v1597_v20 = vsel %vm2791_vm5, 0.0, %v1588_v39  ;;  %v2492_v37 = vld [vmem:[%s3632_s3] sm:$0xff] }
 0x350   :  { %v1595_v15 = vsel %vm3731_vm3, 0.0, %v1590_v60  ;;  %v1612_v33 = vpack.c.bf16 %v1598_v57, %v1597_v20  ;;  %v1600_v51 = vsel %vm2921_vm10, 0.0, %v1585_v43  ;;  %v1599_v58 = vsel %vm2883_vm8, 0.0, %v1586_v3 }
 0x351   :  { %2374 = vmatmul.msk.bf16.vlgmr.msra.gmra.mxu3 %vm633_vm1, %v1610_v12  ;;  %v1611_v46 = vpack.c.bf16 %v1596_v23, %v1595_v15  ;;  %v1613_v50 = vpack.c.bf16 %v1600_v51, %v1599_v58 }
 0x352   :  { %1940 = vmatpush.bf16.msra.mxu2 %v2493_v24 }
 0x356   :  { %1941 = vmatpush.bf16.msra.mxu2 %v2492_v37 }
 0x359   :  { %2405 = vmatmul.msk.bf16.gmra.mxu0 %vm633_vm1, %v1793_v30 }
 0x361   :  { %2375 = vmatmul.msk.bf16.gmra.mxu3 %vm633_vm1, %v1611_v46 }
 0x371   :  { %2376 = vmatmul.msk.bf16.gmra.mxu3 %vm633_vm1, %v1612_v33 }
 0x381   :  { %2377 = vmatmul.msk.bf16.gmra.mxu3 %vm633_vm1, %v1613_v50 }
 0x3a0   :  { %v1672_v53 = vpop.f32.mrf.mxu2 }
 0x3a6   :  { %v1839_v26 = vpop.f32.mrf.mxu0 }
 0x3a8   :  { %v1674_v59 = vpop.f32.mrf.mxu2 }
 0x3ae   :  { %v1841_v8 = vpop.f32.mrf.mxu0 }
 0x3b0   :  { %v1677_v47 = vpop.f32.mrf.mxu2 }
 0x3b6   :  { %v1844_v25 = vpop.f32.mrf.mxu0 }
 0x3b8   :  { %v1679_v61 = vpop.f32.mrf.mxu2 }
 0x3be   :  { %v1846_v27 = vpop.f32.mrf.mxu0 }
 0x3c0   :  { %v1682_v48 = vpop.f32.mrf.mxu2 }
 0x3c6   :  { %v1849_v19 = vpop.f32.mrf.mxu0 }
 0x3c8   :  { %v1684_v36 = vpop.f32.mrf.mxu2 }
 0x3ce   :  { %v1851_v21 = vpop.f32.mrf.mxu0 }
 0x3d0   :  { %v1687_v10 = vpop.f32.mrf.mxu2 }
 0x3d4   :  { %v1737_v40 = vpop.f32.mrf.mxu3 }
 0x3d5   :  { %v1738_v56 = vadd.f32 %v1737_v40, %v1672_v53 }
 0x3d6   :  { %v1854_v32 = vpop.f32.mrf.mxu0 }
 0x3d7   :  { %v1859_v38 = vadd.f32 %v1839_v26, %v1738_v56 }
 0x3d8   :  { %v1689_v35 = vpop.f32.mrf.mxu2 }
 0x3d9   :  { %v1867_v3 = vadd.f32 %v1859_v38, %v3253_v31 }
 0x3dc   :  { %v1739_v54 = vpop.f32.mrf.mxu3 }
 0x3dd   :  { %v1740_v46 = vadd.f32 %v1739_v54, %v1674_v59 }
 0x3de   :  { %v1856_v18 = vpop.f32.mrf.mxu0 }
 0x3df   :  { %v1860_v20 = vadd.f32 %v1841_v8, %v1740_v46 }
 0x3e4   :  { %v1742_v45 = vpop.f32.mrf.mxu3 }
 0x3e5   :  { %v1743_v4 = vadd.f32 %v1742_v45, %v1677_v47 }
 0x3e7   :  { %v1861_v39 = vadd.f32 %v1844_v25, %v1743_v4 }
 0x3e9   :  { %v1869_v43 = vadd.f32 %v1861_v39, %v3277_v11 }
 0x3ec   :  { %v1744_v17 = vpop.f32.mrf.mxu3 }
 0x3ed   :  { %v1745_v22 = vadd.f32 %v1744_v17, %v1679_v61 }
 0x3ef   :  { %v1862_v2 = vadd.f32 %v1846_v27, %v1745_v22 }
 0x3f1   :  { %v1870_v33 = vadd.f32 %v1862_v2, %v3297_v55 }
 0x3f4   :  { %v1747_v34 = vpop.f32.mrf.mxu3 }
 0x3f5   :  { %v1748_v12 = vadd.f32 %v1747_v34, %v1682_v48 }
 0x3f7   :  { %v1863_v60 = vadd.f32 %v1849_v19, %v1748_v12 }
 0x3f9   :  { %v1871_v57 = vadd.f32 %v1863_v60, %v3317_v6  ;;  %v1875_v6 = vld [vmem:[%s3633_s4] sm:$0xf] }
 0x3fc   :  { %v1749_v5 = vpop.f32.mrf.mxu3 }
 0x3fd   :  { %v1750_v42 = vadd.f32 %v1749_v5, %v1684_v36 }
 0x3ff   :  { %v1864_v29 = vadd.f32 %v1851_v21, %v1750_v42 }
 0x401   :  { %v1872_v14 = vadd.f32 %v1864_v29, %v3332_v62 }
 0x403   :  { %v1878_v0 = vpack.c.bf16 %v1872_v14, %v1871_v57 }
 0x404   :  { %v1752_v63 = vpop.f32.mrf.mxu3 }
 0x405   :  { %v1753_v41 = vadd.f32 %v1752_v63, %v1687_v10 }
 0x407   :  { %v1865_v44 = vadd.f32 %v1854_v32, %v1753_v41 }
 0x409   :  { %v1873_v23 = vadd.f32 %v1865_v44, %v3348_v13  ;;  %v1868_v13 = vadd.f32 %v1860_v20, %v3267_v7  ;;  %v2508_v7 = vld [vmem:[%s3629_s5 + $0x9] ss:$0 sm:$0xff] }
 0x40b   :  { %v1876_v51 = vpack.c.bf16 %v1868_v13, %v1867_v3 }
 0x40c   :  { %v1754_v28 = vpop.f32.mrf.mxu3 }
 0x40d   :  { %v1755_v52 = vadd.f32 %v1754_v28, %v1689_v35 }
 0x40f   :  { %v1866_v30 = vadd.f32 %v1856_v18, %v1755_v52 }
 0x411   :  { %v1874_v15 = vadd.f32 %v1866_v30, %v3357_v16  ;;  %v1877_v16 = vpack.c.bf16 %v1870_v33, %v1869_v43 }
 0x413   :  { %v1879_v9 = vpack.c.bf16 %v1874_v15, %v1873_v23 }
 0x415   :  { %1887 = vmatpush.bf16.msra.mxu1 %v1879_v9 }
 0x419   :  { %1888 = vmatpush.bf16.msra.mxu1 %v1878_v0 }
 0x41d   :  { %1889 = vmatpush.bf16.msra.mxu1 %v1877_v16 }
 0x421   :  { %1890 = vmatpush.bf16.msra.mxu1 %v1876_v51 }
 0x424   :  { %2406 = vmatmul.msk.bf16.vlgmr.msra.gmra.mxu1 %vm633_vm1, %v1875_v6 }
 0x4a1   :  { %v1892_v62 = vpop.f32.mrf.mxu1 }
 0x4a2   :  { %v1904_v55 = vpack.c.bf16 %v1892_v62, %v1892_v62 }
 0x4a4   :  { %2423 = vmatmul.msk.bf16.vlgmr.msra.gmra.mxu2 %vm633_vm1, %v1904_v55 }
 0x4a9   :  { %v1894_v11 = vpop.f32.mrf.mxu1 }
 0x527   :  { %v1943_v58 = vpop.f32.mrf.mxu2 }
 0x528   :  { %v1944_v31 = vadd.f32 %v2508_v7, %v1943_v58 }
 0x52a   :  { %1947 = vst [vmem:[%s3634_s6] sm:$0xff] %v1944_v31 }
 0x52f   :  { %v1945_v50 = vpop.f32.mrf.mxu2 }

</bundles_post_ra>
